<compile_context>
chip_gen: v6e
topology: v6e:2x2x1
jax: 0.10.0
libtpu: 0.0.40
codegen_flags: <defaults>
</compile_context>

<pallas_src>
import jax
import jax.numpy as jnp
from jax import lax
from jax.experimental import pallas as pl
from jax.experimental.pallas import tpu as pltpu


def _round_up(x, m):
    return (x + m - 1) // m * m


def _largest_divisor_leq(n, cap):
    cap = max(1, min(n, int(cap)))
    for d in range(cap, 0, -1):
        if n % d == 0:
            return d
    return 1


def _vmem_capacity_bytes():
    try:
        return int(pltpu.get_tpu_info().vmem_capacity_bytes)
    except Exception:
        return 64 * 1024 * 1024          # conservative fallback (v7x per-core VMEM)


def _tensorcores_per_chip():
    try:
        kind = jax.devices()[0].device_kind.lower()
        if "v7" in kind or "7x" in kind:  # v7x has 2 TensorCores per chip
            return 2
    except Exception:
        pass
    return 1


def _make_lstm_kernel(t_chunk, unroll, Hp):
    """Build the recurrence kernel for a given (static) time-chunk / unroll / padded H."""
    n_sub = t_chunk // unroll

    def kernel(xp_ref, b_ref, b_fc_ref, w_hh_hbm, w_fc_hbm, out_ref,
               h_scr, c_scr, w_hh_scr, w_fc_scr, sem):
        # Grid: (batch tiles [parallel], time chunks [arbitrary, serial]).
        # xp_ref:   (T_CHUNK, B_TILE, 4Hp) bf16   precomputed x@W_ih^T, time-major
        # b_ref:    (1, 4Hp) f32                  b_ih + b_hh
        # b_fc_ref: (1, Op)  f32
        # w_hh_hbm: (Hp, 4Hp) bf16 in HBM         -> single-copy VMEM scratch w_hh_scr
        # w_fc_hbm: (Hp, Op)  bf16 in HBM         -> single-copy VMEM scratch w_fc_scr
        # out_ref:  (B_TILE, Op) f32              fc(h_T), written on the last time chunk
        # h_scr/c_scr: (B_TILE, Hp) f32           recurrent state, persists across chunks
        tc = pl.program_id(1)
        n_tc = pl.num_programs(1)

        @pl.when(tc == 0)
        def _():
            # Single-buffered weights: DMA from HBM into persistent VMEM scratch once per
            # batch tile; zero-init the recurrent state while the DMAs are in flight.
            cp_hh = pltpu.make_async_copy(w_hh_hbm, w_hh_scr, sem.at[0])
            cp_fc = pltpu.make_async_copy(w_fc_hbm, w_fc_scr, sem.at[1])
            cp_hh.start()
            cp_fc.start()
            h_scr[...] = jnp.zeros_like(h_scr)
            c_scr[...] = jnp.zeros_like(c_scr)
            cp_hh.wait()
            cp_fc.wait()

        bias = b_ref[...]            # (1, 4Hp) f32, hoisted out of the step loop

        # Recurrence is strictly serial (h_t feeds step t+1); loop over sub-chunks with a
        # small static unroll (4-8), carrying h/c in registers within a sub-chunk and
        # touching VMEM scratch only at sub-chunk boundaries.
        @pl.loop(0, n_sub)
        def _(s):
            base = s * unroll
            h = h_scr[...]
            c = c_scr[...]
            for u in range(unroll):  # static unroll
                gates = (xp_ref[base + u].astype(jnp.float32) + bias
                         + jnp.dot(h.astype(jnp.bfloat16), w_hh_scr[...],
                                   preferred_element_type=jnp.float32))
                i = jax.nn.sigmoid(gates[:, 0 * Hp:1 * Hp])
                f = jax.nn.sigmoid(gates[:, 1 * Hp:2 * Hp])
                g = jnp.tanh(gates[:, 2 * Hp:3 * Hp])
                o = jax.nn.sigmoid(gates[:, 3 * Hp:4 * Hp])
                c = f * c + i * g
                h = o * jnp.tanh(c)
            h_scr[...] = h
            c_scr[...] = c

        @pl.when(tc == n_tc - 1)
        def _():
            # out[:, -1, :] of a 1-layer LSTM is exactly h_T; fc applied here, lane-dense
            # (Op padded to 128) so the store is an unmasked vst.
            out_ref[...] = (jnp.dot(h_scr[...].astype(jnp.bfloat16), w_fc_scr[...],
                                    preferred_element_type=jnp.float32)
                            + b_fc_ref[...])

    return kernel


def lstm_network_forward(x, params):
    """Forward of LSTMNetwork (num_layers=1). x: (B, T, D) batch-first, like PyTorch."""
    w_ih, w_hh, b_ih, b_hh, w_fc, b_fc = params
    B, T, D = x.shape
    H = w_hh.shape[1]          # w_hh: (4H, H)
    O = w_fc.shape[0]          # w_fc: (O, H)

    f32, bf16 = jnp.float32, jnp.bfloat16

    # Lane/sublane-aligned padded sizes.
    Hp = _round_up(H, 128)
    Op = _round_up(O, 128)

    # Batch tiling: keep >=2 tiles on v7x (2 TensorCores) when B permits; one larger tile
    # on single-core chips for better MXU row utilization.
    n_cores = _tensorcores_per_chip()
    if B > 256:
        B_TILE = 256
        Bp = _round_up(B, 256)
    elif n_cores >= 2 and B >= 16:
        half = (_round_up(B, 8) + 1) // 2
        B_TILE = _round_up(half, 8)
        Bp = 2 * B_TILE
    else:
        Bp = _round_up(B, 8)
        B_TILE = Bp

    # VMEM-budget-aware streaming chunk: vmem_limit = 3/4 of physical per-core VMEM
    # (~96 MiB on v5e/v6e, ~48 MiB on v7x); size T_CHUNK so the double-buffered bf16 xp
    # block plus all resident scratch fits with headroom.
    vmem_cap = _vmem_capacity_bytes()
    vmem_limit = max(32 * 1024 * 1024, (vmem_cap * 3) // 4)
    fixed_vmem = (
        (Hp * 4 * Hp + Hp * Op) * 2          # single-copy weight scratch (bf16)
        + 2 * B_TILE * Hp * 4                # h/c state scratch (f32)
        + 2 * B_TILE * Op * 4                # output block, double-buffered (f32)
        + 2 * (4 * Hp + Op) * 4 * 8          # bias blocks, double-buffered + sublane pad
    )
    xp_budget = vmem_limit - fixed_vmem - 6 * 1024 * 1024   # slack for compiler temps
    per_step_bytes = 2 * B_TILE * 4 * Hp * 2                # double-buffered bf16 xp/step
    t_cap = max(1, xp_budget // per_step_bytes)
    T_CHUNK = _largest_divisor_leq(T, t_cap)
    UNROLL = _largest_divisor_leq(T_CHUNK, 8)                # 4-8 step static unroll

    def pad_gate_rows(w, k_pad=None):
        # (4H, K) -> (4Hp, K[->k_pad]); pad each of the i/f/g/o blocks separately.
        K = w.shape[1]
        w4 = jnp.pad(w.reshape(4, H, K), ((0, 0), (0, Hp - H), (0, 0)))
        w4 = w4.reshape(4 * Hp, K)
        if k_pad is not None and k_pad != K:
            w4 = jnp.pad(w4, ((0, 0), (0, k_pad - K)))
        return w4

    w_ih_p = pad_gate_rows(w_ih.astype(f32))                        # (4Hp, D)
    w_hh_p = pad_gate_rows(w_hh.astype(f32), k_pad=Hp)              # (4Hp, Hp)
    b_p = jnp.pad((b_ih + b_hh).astype(f32).reshape(4, H),
                  ((0, 0), (0, Hp - H))).reshape(1, 4 * Hp)         # (1, 4Hp)
    w_fc_p = jnp.pad(w_fc.astype(f32), ((0, Op - O), (0, Hp - H)))  # (Op, Hp)
    b_fc_p = jnp.pad(b_fc.astype(f32), (0, Op - O)).reshape(1, Op)  # (1, Op)

    x_p = jnp.pad(x.astype(f32), ((0, Bp - B), (0, 0), (0, 0)))     # (Bp, T, D)

    # Hoisted input projection: ONE big MXU matmul over all timesteps (bf16 operands,
    # f32 accumulate), stored bf16 and time-major; bias is added in f32 inside the kernel
    # so no full-tensor broadcast pass happens here.
    xp = jnp.einsum('btd,gd->tbg', x_p.astype(bf16), w_ih_p.astype(bf16),
                    preferred_element_type=f32).astype(bf16)        # (T, Bp, 4Hp) bf16

    kernel = _make_lstm_kernel(T_CHUNK, UNROLL, Hp)
    grid = (Bp // B_TILE, T // T_CHUNK)

    out_p = pl.pallas_call(
        kernel,
        out_shape=jax.ShapeDtypeStruct((Bp, Op), f32),
        grid_spec=pltpu.PrefetchScalarGridSpec(
            num_scalar_prefetch=0,
            grid=grid,
            in_specs=[
                pl.BlockSpec((T_CHUNK, B_TILE, 4 * Hp), lambda bi, tc: (tc, bi, 0)),
                pl.BlockSpec((1, 4 * Hp), lambda bi, tc: (0, 0)),
                pl.BlockSpec((1, Op), lambda bi, tc: (0, 0)),
                pl.BlockSpec(memory_space=pl.ANY),   # w_hh^T stays in HBM, DMA'd once
                pl.BlockSpec(memory_space=pl.ANY),   # w_fc^T stays in HBM, DMA'd once
            ],
            out_specs=pl.BlockSpec((B_TILE, Op), lambda bi, tc: (bi, 0)),
            scratch_shapes=[
                pltpu.VMEM((B_TILE, Hp), f32),       # h state
                pltpu.VMEM((B_TILE, Hp), f32),       # c state
                pltpu.VMEM((Hp, 4 * Hp), bf16),      # w_hh^T (single copy)
                pltpu.VMEM((Hp, Op), bf16),          # w_fc^T (single copy)
                pltpu.SemaphoreType.DMA((2,)),
            ],
        ),
        compiler_params=pltpu.CompilerParams(
            dimension_semantics=("parallel", "arbitrary"),
            vmem_limit_bytes=int(vmem_limit),
        ),
    )(xp, b_p, b_fc_p,
      jnp.transpose(w_hh_p).astype(bf16),            # (Hp, 4Hp)
      jnp.transpose(w_fc_p).astype(bf16))            # (Hp, Op)

    return out_p[:B, :O]


def init_params(key, input_dim, hidden_dim, output_dim):
    """Deterministic init, same shapes as nn.LSTM(input_dim, hidden_dim) + nn.Linear."""
    k = jax.random.split(key, 6)
    s = 1.0 / jnp.sqrt(hidden_dim)
    w_ih = jax.random.uniform(k[0], (4 * hidden_dim, input_dim), jnp.float32, -s, s)
    w_hh = jax.random.uniform(k[1], (4 * hidden_dim, hidden_dim), jnp.float32, -s, s)
    b_ih = jax.random.uniform(k[2], (4 * hidden_dim,), jnp.float32, -s, s)
    b_hh = jax.random.uniform(k[3], (4 * hidden_dim,), jnp.float32, -s, s)
    w_fc = jax.random.uniform(k[4], (output_dim, hidden_dim), jnp.float32, -s, s)
    b_fc = jax.random.uniform(k[5], (output_dim,), jnp.float32, -s, s)
    return (w_ih, w_hh, b_ih, b_hh, w_fc, b_fc)


def reference_forward(x, params):
    """Pure-JAX f32 reference of the PyTorch forward (num_layers=1)."""
    w_ih, w_hh, b_ih, b_hh, w_fc, b_fc = params
    B, T, D = x.shape
    H = w_hh.shape[1]
    h = jnp.zeros((B, H), jnp.float32)
    c = jnp.zeros((B, H), jnp.float32)
    for t in range(T):
        gates = x[:, t, :] @ w_ih.T + b_ih + h @ w_hh.T + b_hh
        i = jax.nn.sigmoid(gates[:, 0 * H:1 * H])
        f = jax.nn.sigmoid(gates[:, 1 * H:2 * H])
        g = jnp.tanh(gates[:, 2 * H:3 * H])
        o = jax.nn.sigmoid(gates[:, 3 * H:4 * H])
        c = f * c + i * g
        h = o * jnp.tanh(c)
    return h @ w_fc.T + b_fc


if __name__ == "__main__":
    B, T, D, H, O = 2, 8, 16, 32, 8   # batch, seq, input_dim, hidden_dim, output_dim

    key = jax.random.PRNGKey(0)
    kx, kp = jax.random.split(key)
    x = jax.random.normal(kx, (B, T, D), jnp.float32)
    params = init_params(kp, D, H, O)

    forward = jax.jit(lstm_network_forward)
    out = forward(x, params)
    out = jax.block_until_ready(out)

    ref = reference_forward(x, params)
    assert out.shape == (B, O)
    max_err = jnp.max(jnp.abs(out - ref))
    # bf16 matmul operands / bf16-stored xp (f32 accumulate, f32 state & gating)
    # -> loosened tolerance.
    assert jnp.allclose(out, ref, atol=2e-2, rtol=2e-2), (
        f"mismatch: max abs err {max_err}")

    print("KERNEL_OK")
</pallas_src>

<mosaic_0001>
module attributes {stable_mosaic.version = 11 : i64} {
  func.func @kernel(%arg0: i32, %arg1: i32, %arg2: memref<8x8x512xbf16, #tpu.memory_space<vmem>>, %arg3: memref<1x512xf32, #tpu.memory_space<vmem>>, %arg4: memref<1x128xf32, #tpu.memory_space<vmem>>, %arg5: memref<128x512xbf16, #tpu.memory_space<any>>, %arg6: memref<128x128xbf16, #tpu.memory_space<any>>, %arg7: memref<8x128xf32, #tpu.memory_space<vmem>>, %arg8: memref<8x128xf32, #tpu.memory_space<vmem>>, %arg9: memref<8x128xf32, #tpu.memory_space<vmem>>, %arg10: memref<128x512xbf16, #tpu.memory_space<vmem>>, %arg11: memref<128x128xbf16, #tpu.memory_space<vmem>>, %arg12: memref<2x!tpu.dma_semaphore, #tpu.memory_space<semaphore_mem>>) attributes {dimension_semantics = [#tpu.dimension_semantics<parallel>, #tpu.dimension_semantics<arbitrary>], iteration_bounds = array<i64: 1, 1>, scalar_prefetch = 0 : i64, scratch_operands = 5 : i64, tpu.core_type = #tpu.core_type<tc>, window_params = [{transform_indices = @transform_0, window_bounds = array<i64: 8, 8, 512>}, {pipeline_mode = #tpu.pipeline_mode<synchronous>, transform_indices = @transform_1, window_bounds = array<i64: 1, 512>}, {pipeline_mode = #tpu.pipeline_mode<synchronous>, transform_indices = @transform_2, window_bounds = array<i64: 1, 128>}, {}, {}, {transform_indices = @transform_5, window_bounds = array<i64: 8, 128>}]} {
    %c0_i32 = arith.constant 0 : i32
    %0 = arith.cmpi eq, %arg1, %c0_i32 : i32
    %1 = arith.extui %0 : i1 to i32
    %c0_i32_0 = arith.constant 0 : i32
    %2 = arith.cmpi ne, %1, %c0_i32_0 : i32
    scf.if %2 {
      %c0_i32_80 = arith.constant 0 : i32
      %302 = tpu.memref_slice %arg12[%c0_i32_80] : memref<2x!tpu.dma_semaphore, #tpu.memory_space<semaphore_mem>> -> memref<1x!tpu.dma_semaphore, #tpu.memory_space<semaphore_mem>>
      %303 = tpu.memref_squeeze %302 : memref<1x!tpu.dma_semaphore, #tpu.memory_space<semaphore_mem>> -> memref<!tpu.dma_semaphore, #tpu.memory_space<semaphore_mem>>
      tpu.enqueue_dma source(%arg5 : memref<128x512xbf16, #tpu.memory_space<any>>) target(%arg10 : memref<128x512xbf16, #tpu.memory_space<vmem>>) target_semaphore(%303 : memref<!tpu.dma_semaphore, #tpu.memory_space<semaphore_mem>>)
      %c1_i32_81 = arith.constant 1 : i32
      %304 = tpu.memref_slice %arg12[%c1_i32_81] : memref<2x!tpu.dma_semaphore, #tpu.memory_space<semaphore_mem>> -> memref<1x!tpu.dma_semaphore, #tpu.memory_space<semaphore_mem>>
      %305 = tpu.memref_squeeze %304 : memref<1x!tpu.dma_semaphore, #tpu.memory_space<semaphore_mem>> -> memref<!tpu.dma_semaphore, #tpu.memory_space<semaphore_mem>>
      tpu.enqueue_dma source(%arg6 : memref<128x128xbf16, #tpu.memory_space<any>>) target(%arg11 : memref<128x128xbf16, #tpu.memory_space<vmem>>) target_semaphore(%305 : memref<!tpu.dma_semaphore, #tpu.memory_space<semaphore_mem>>)
      %cst_82 = arith.constant 0.000000e+00 : f32
      %306 = vector.broadcast %cst_82 : f32 to vector<8x128xf32>
      %c0_83 = arith.constant 0 : index
      %c0_84 = arith.constant 0 : index
      %307 = vector.load %arg8[%c0_83, %c0_84] : memref<8x128xf32, #tpu.memory_space<vmem>>, vector<8x128xf32>
      tpu.vector_store %arg8[%c0_83, %c0_84], %306 {strides = array<i32>} : memref<8x128xf32, #tpu.memory_space<vmem>>, vector<8x128xf32>,
      %cst_85 = arith.constant 0.000000e+00 : f32
      %308 = vector.broadcast %cst_85 : f32 to vector<8x128xf32>
      %c0_86 = arith.constant 0 : index
      %c0_87 = arith.constant 0 : index
      %309 = vector.load %arg9[%c0_86, %c0_87] : memref<8x128xf32, #tpu.memory_space<vmem>>, vector<8x128xf32>
      tpu.vector_store %arg9[%c0_86, %c0_87], %308 {strides = array<i32>} : memref<8x128xf32, #tpu.memory_space<vmem>>, vector<8x128xf32>,
      %c0_i32_88 = arith.constant 0 : i32
      %310 = tpu.memref_slice %arg12[%c0_i32_88] : memref<2x!tpu.dma_semaphore, #tpu.memory_space<semaphore_mem>> -> memref<1x!tpu.dma_semaphore, #tpu.memory_space<semaphore_mem>>
      %311 = tpu.memref_squeeze %310 : memref<1x!tpu.dma_semaphore, #tpu.memory_space<semaphore_mem>> -> memref<!tpu.dma_semaphore, #tpu.memory_space<semaphore_mem>>
      tpu.wait_dma2 semaphore(%311 : memref<!tpu.dma_semaphore, #tpu.memory_space<semaphore_mem>>) src(%arg5 : memref<128x512xbf16, #tpu.memory_space<any>>) dst(%arg10 : memref<128x512xbf16, #tpu.memory_space<vmem>>)
      %c1_i32_89 = arith.constant 1 : i32
      %312 = tpu.memref_slice %arg12[%c1_i32_89] : memref<2x!tpu.dma_semaphore, #tpu.memory_space<semaphore_mem>> -> memref<1x!tpu.dma_semaphore, #tpu.memory_space<semaphore_mem>>
      %313 = tpu.memref_squeeze %312 : memref<1x!tpu.dma_semaphore, #tpu.memory_space<semaphore_mem>> -> memref<!tpu.dma_semaphore, #tpu.memory_space<semaphore_mem>>
      tpu.wait_dma2 semaphore(%313 : memref<!tpu.dma_semaphore, #tpu.memory_space<semaphore_mem>>) src(%arg6 : memref<128x128xbf16, #tpu.memory_space<any>>) dst(%arg11 : memref<128x128xbf16, #tpu.memory_space<vmem>>)
    } else {
    }
    %c0 = arith.constant 0 : index
    %c0_1 = arith.constant 0 : index
    %3 = vector.load %arg3[%c0, %c0_1] : memref<1x512xf32, #tpu.memory_space<vmem>>, vector<1x512xf32>
    %c0_i32_2 = arith.constant 0 : i32
    %c1_i32 = arith.constant 1 : i32
    %4 = arith.muli %c0_i32_2, %c1_i32 : i32
    %c0_i32_3 = arith.constant 0 : i32
    %5 = arith.addi %c0_i32_3, %4 : i32
    %c8_i32 = arith.constant 8 : i32
    %6 = arith.muli %5, %c8_i32 : i32
    %c0_4 = arith.constant 0 : index
    %c0_5 = arith.constant 0 : index
    %7 = vector.load %arg8[%c0_4, %c0_5] : memref<8x128xf32, #tpu.memory_space<vmem>>, vector<8x128xf32>
    %c0_6 = arith.constant 0 : index
    %c0_7 = arith.constant 0 : index
    %8 = vector.load %arg9[%c0_6, %c0_7] : memref<8x128xf32, #tpu.memory_space<vmem>>, vector<8x128xf32>
    %c0_i32_8 = arith.constant 0 : i32
    %9 = arith.addi %6, %c0_i32_8 : i32
    %10 = arith.index_cast %9 : i32 to index
    %c0_9 = arith.constant 0 : index
    %c0_10 = arith.constant 0 : index
    %11 = vector.load %arg2[%10, %c0_9, %c0_10] : memref<8x8x512xbf16, #tpu.memory_space<vmem>>, vector<1x8x512xbf16>
    %12 = vector.shape_cast %11 : vector<1x8x512xbf16> to vector<8x512xbf16>
    %13 = arith.extf %12 : vector<8x512xbf16> to vector<8x512xf32>
    %14 = vector.broadcast %3 : vector<1x512xf32> to vector<8x512xf32>
    %15 = arith.addf %13, %14 : vector<8x512xf32>
    %16 = arith.truncf %7 : vector<8x128xf32> to vector<8x128xbf16>
    %c0_11 = arith.constant 0 : index
    %c0_12 = arith.constant 0 : index
    %17 = vector.load %arg10[%c0_11, %c0_12] : memref<128x512xbf16, #tpu.memory_space<vmem>>, vector<128x512xbf16>
    %cst = arith.constant dense<0.000000e+00> : vector<8x512xf32>
    %18 = tpu.matmul %16, %17, %cst {dimension_numbers = #tpu.dot_dimension_numbers<[1], [0], [0], [1], [0, 0, 1, 1], [], []>} : vector<8x128xbf16>, vector<128x512xbf16>, vector<8x512xf32> -> vector<8x512xf32>
    %19 = arith.addf %15, %18 : vector<8x512xf32>
    %20 = vector.extract_strided_slice %19 {offsets = [0, 0], sizes = [8, 128], strides = [1, 1]} : vector<8x512xf32> to vector<8x128xf32>
    %21 = arith.negf %20 : vector<8x128xf32>
    %22 = math.exp %21 : vector<8x128xf32>
    %cst_13 = arith.constant 1.000000e+00 : f32
    %23 = vector.broadcast %cst_13 : f32 to vector<8x128xf32>
    %24 = arith.addf %23, %22 : vector<8x128xf32>
    %25 = arith.divf %23, %24 : vector<8x128xf32>
    %26 = vector.extract_strided_slice %19 {offsets = [0, 128], sizes = [8, 128], strides = [1, 1]} : vector<8x512xf32> to vector<8x128xf32>
    %27 = arith.negf %26 : vector<8x128xf32>
    %28 = math.exp %27 : vector<8x128xf32>
    %cst_14 = arith.constant 1.000000e+00 : f32
    %29 = vector.broadcast %cst_14 : f32 to vector<8x128xf32>
    %30 = arith.addf %29, %28 : vector<8x128xf32>
    %31 = arith.divf %29, %30 : vector<8x128xf32>
    %32 = vector.extract_strided_slice %19 {offsets = [0, 256], sizes = [8, 128], strides = [1, 1]} : vector<8x512xf32> to vector<8x128xf32>
    %33 = math.tanh %32 : vector<8x128xf32>
    %34 = vector.extract_strided_slice %19 {offsets = [0, 384], sizes = [8, 128], strides = [1, 1]} : vector<8x512xf32> to vector<8x128xf32>
    %35 = arith.negf %34 : vector<8x128xf32>
    %36 = math.exp %35 : vector<8x128xf32>
    %cst_15 = arith.constant 1.000000e+00 : f32
    %37 = vector.broadcast %cst_15 : f32 to vector<8x128xf32>
    %38 = arith.addf %37, %36 : vector<8x128xf32>
    %39 = arith.divf %37, %38 : vector<8x128xf32>
    %40 = arith.mulf %31, %8 : vector<8x128xf32>
    %41 = arith.mulf %25, %33 : vector<8x128xf32>
    %42 = arith.addf %40, %41 : vector<8x128xf32>
    %43 = math.tanh %42 : vector<8x128xf32>
    %44 = arith.mulf %39, %43 : vector<8x128xf32>
    %c1_i32_16 = arith.constant 1 : i32
    %45 = arith.addi %6, %c1_i32_16 : i32
    %46 = arith.index_cast %45 : i32 to index
    %c0_17 = arith.constant 0 : index
    %c0_18 = arith.constant 0 : index
    %47 = vector.load %arg2[%46, %c0_17, %c0_18] : memref<8x8x512xbf16, #tpu.memory_space<vmem>>, vector<1x8x512xbf16>
    %48 = vector.shape_cast %47 : vector<1x8x512xbf16> to vector<8x512xbf16>
    %49 = arith.extf %48 : vector<8x512xbf16> to vector<8x512xf32>
    %50 = vector.broadcast %3 : vector<1x512xf32> to vector<8x512xf32>
    %51 = arith.addf %49, %50 : vector<8x512xf32>
    %52 = arith.truncf %44 : vector<8x128xf32> to vector<8x128xbf16>
    %c0_19 = arith.constant 0 : index
    %c0_20 = arith.constant 0 : index
    %53 = vector.load %arg10[%c0_19, %c0_20] : memref<128x512xbf16, #tpu.memory_space<vmem>>, vector<128x512xbf16>
    %cst_21 = arith.constant dense<0.000000e+00> : vector<8x512xf32>
    %54 = tpu.matmul %52, %53, %cst_21 {dimension_numbers = #tpu.dot_dimension_numbers<[1], [0], [0], [1], [0, 0, 1, 1], [], []>} : vector<8x128xbf16>, vector<128x512xbf16>, vector<8x512xf32> -> vector<8x512xf32>
    %55 = arith.addf %51, %54 : vector<8x512xf32>
    %56 = vector.extract_strided_slice %55 {offsets = [0, 0], sizes = [8, 128], strides = [1, 1]} : vector<8x512xf32> to vector<8x128xf32>
    %57 = arith.negf %56 : vector<8x128xf32>
    %58 = math.exp %57 : vector<8x128xf32>
    %cst_22 = arith.constant 1.000000e+00 : f32
    %59 = vector.broadcast %cst_22 : f32 to vector<8x128xf32>
    %60 = arith.addf %59, %58 : vector<8x128xf32>
    %61 = arith.divf %59, %60 : vector<8x128xf32>
    %62 = vector.extract_strided_slice %55 {offsets = [0, 128], sizes = [8, 128], strides = [1, 1]} : vector<8x512xf32> to vector<8x128xf32>
    %63 = arith.negf %62 : vector<8x128xf32>
    %64 = math.exp %63 : vector<8x128xf32>
    %cst_23 = arith.constant 1.000000e+00 : f32
    %65 = vector.broadcast %cst_23 : f32 to vector<8x128xf32>
    %66 = arith.addf %65, %64 : vector<8x128xf32>
    %67 = arith.divf %65, %66 : vector<8x128xf32>
    %68 = vector.extract_strided_slice %55 {offsets = [0, 256], sizes = [8, 128], strides = [1, 1]} : vector<8x512xf32> to vector<8x128xf32>
    %69 = math.tanh %68 : vector<8x128xf32>
    %70 = vector.extract_strided_slice %55 {offsets = [0, 384], sizes = [8, 128], strides = [1, 1]} : vector<8x512xf32> to vector<8x128xf32>
    %71 = arith.negf %70 : vector<8x128xf32>
    %72 = math.exp %71 : vector<8x128xf32>
    %cst_24 = arith.constant 1.000000e+00 : f32
    %73 = vector.broadcast %cst_24 : f32 to vector<8x128xf32>
    %74 = arith.addf %73, %72 : vector<8x128xf32>
    %75 = arith.divf %73, %74 : vector<8x128xf32>
    %76 = arith.mulf %67, %42 : vector<8x128xf32>
    %77 = arith.mulf %61, %69 : vector<8x128xf32>
    %78 = arith.addf %76, %77 : vector<8x128xf32>
    %79 = math.tanh %78 : vector<8x128xf32>
    %80 = arith.mulf %75, %79 : vector<8x128xf32>
    %c2_i32 = arith.constant 2 : i32
    %81 = arith.addi %6, %c2_i32 : i32
    %82 = arith.index_cast %81 : i32 to index
    %c0_25 = arith.constant 0 : index
    %c0_26 = arith.constant 0 : index
    %83 = vector.load %arg2[%82, %c0_25, %c0_26] : memref<8x8x512xbf16, #tpu.memory_space<vmem>>, vector<1x8x512xbf16>
    %84 = vector.shape_cast %83 : vector<1x8x512xbf16> to vector<8x512xbf16>
    %85 = arith.extf %84 : vector<8x512xbf16> to vector<8x512xf32>
    %86 = vector.broadcast %3 : vector<1x512xf32> to vector<8x512xf32>
    %87 = arith.addf %85, %86 : vector<8x512xf32>
    %88 = arith.truncf %80 : vector<8x128xf32> to vector<8x128xbf16>
    %c0_27 = arith.constant 0 : index
    %c0_28 = arith.constant 0 : index
    %89 = vector.load %arg10[%c0_27, %c0_28] : memref<128x512xbf16, #tpu.memory_space<vmem>>, vector<128x512xbf16>
    %cst_29 = arith.constant dense<0.000000e+00> : vector<8x512xf32>
    %90 = tpu.matmul %88, %89, %cst_29 {dimension_numbers = #tpu.dot_dimension_numbers<[1], [0], [0], [1], [0, 0, 1, 1], [], []>} : vector<8x128xbf16>, vector<128x512xbf16>, vector<8x512xf32> -> vector<8x512xf32>
    %91 = arith.addf %87, %90 : vector<8x512xf32>
    %92 = vector.extract_strided_slice %91 {offsets = [0, 0], sizes = [8, 128], strides = [1, 1]} : vector<8x512xf32> to vector<8x128xf32>
    %93 = arith.negf %92 : vector<8x128xf32>
    %94 = math.exp %93 : vector<8x128xf32>
    %cst_30 = arith.constant 1.000000e+00 : f32
    %95 = vector.broadcast %cst_30 : f32 to vector<8x128xf32>
    %96 = arith.addf %95, %94 : vector<8x128xf32>
    %97 = arith.divf %95, %96 : vector<8x128xf32>
    %98 = vector.extract_strided_slice %91 {offsets = [0, 128], sizes = [8, 128], strides = [1, 1]} : vector<8x512xf32> to vector<8x128xf32>
    %99 = arith.negf %98 : vector<8x128xf32>
    %100 = math.exp %99 : vector<8x128xf32>
    %cst_31 = arith.constant 1.000000e+00 : f32
    %101 = vector.broadcast %cst_31 : f32 to vector<8x128xf32>
    %102 = arith.addf %101, %100 : vector<8x128xf32>
    %103 = arith.divf %101, %102 : vector<8x128xf32>
    %104 = vector.extract_strided_slice %91 {offsets = [0, 256], sizes = [8, 128], strides = [1, 1]} : vector<8x512xf32> to vector<8x128xf32>
    %105 = math.tanh %104 : vector<8x128xf32>
    %106 = vector.extract_strided_slice %91 {offsets = [0, 384], sizes = [8, 128], strides = [1, 1]} : vector<8x512xf32> to vector<8x128xf32>
    %107 = arith.negf %106 : vector<8x128xf32>
    %108 = math.exp %107 : vector<8x128xf32>
    %cst_32 = arith.constant 1.000000e+00 : f32
    %109 = vector.broadcast %cst_32 : f32 to vector<8x128xf32>
    %110 = arith.addf %109, %108 : vector<8x128xf32>
    %111 = arith.divf %109, %110 : vector<8x128xf32>
    %112 = arith.mulf %103, %78 : vector<8x128xf32>
    %113 = arith.mulf %97, %105 : vector<8x128xf32>
    %114 = arith.addf %112, %113 : vector<8x128xf32>
    %115 = math.tanh %114 : vector<8x128xf32>
    %116 = arith.mulf %111, %115 : vector<8x128xf32>
    %c3_i32 = arith.constant 3 : i32
    %117 = arith.addi %6, %c3_i32 : i32
    %118 = arith.index_cast %117 : i32 to index
    %c0_33 = arith.constant 0 : index
    %c0_34 = arith.constant 0 : index
    %119 = vector.load %arg2[%118, %c0_33, %c0_34] : memref<8x8x512xbf16, #tpu.memory_space<vmem>>, vector<1x8x512xbf16>
    %120 = vector.shape_cast %119 : vector<1x8x512xbf16> to vector<8x512xbf16>
    %121 = arith.extf %120 : vector<8x512xbf16> to vector<8x512xf32>
    %122 = vector.broadcast %3 : vector<1x512xf32> to vector<8x512xf32>
    %123 = arith.addf %121, %122 : vector<8x512xf32>
    %124 = arith.truncf %116 : vector<8x128xf32> to vector<8x128xbf16>
    %c0_35 = arith.constant 0 : index
    %c0_36 = arith.constant 0 : index
    %125 = vector.load %arg10[%c0_35, %c0_36] : memref<128x512xbf16, #tpu.memory_space<vmem>>, vector<128x512xbf16>
    %cst_37 = arith.constant dense<0.000000e+00> : vector<8x512xf32>
    %126 = tpu.matmul %124, %125, %cst_37 {dimension_numbers = #tpu.dot_dimension_numbers<[1], [0], [0], [1], [0, 0, 1, 1], [], []>} : vector<8x128xbf16>, vector<128x512xbf16>, vector<8x512xf32> -> vector<8x512xf32>
    %127 = arith.addf %123, %126 : vector<8x512xf32>
    %128 = vector.extract_strided_slice %127 {offsets = [0, 0], sizes = [8, 128], strides = [1, 1]} : vector<8x512xf32> to vector<8x128xf32>
    %129 = arith.negf %128 : vector<8x128xf32>
    %130 = math.exp %129 : vector<8x128xf32>
    %cst_38 = arith.constant 1.000000e+00 : f32
    %131 = vector.broadcast %cst_38 : f32 to vector<8x128xf32>
    %132 = arith.addf %131, %130 : vector<8x128xf32>
    %133 = arith.divf %131, %132 : vector<8x128xf32>
    %134 = vector.extract_strided_slice %127 {offsets = [0, 128], sizes = [8, 128], strides = [1, 1]} : vector<8x512xf32> to vector<8x128xf32>
    %135 = arith.negf %134 : vector<8x128xf32>
    %136 = math.exp %135 : vector<8x128xf32>
    %cst_39 = arith.constant 1.000000e+00 : f32
    %137 = vector.broadcast %cst_39 : f32 to vector<8x128xf32>
    %138 = arith.addf %137, %136 : vector<8x128xf32>
    %139 = arith.divf %137, %138 : vector<8x128xf32>
    %140 = vector.extract_strided_slice %127 {offsets = [0, 256], sizes = [8, 128], strides = [1, 1]} : vector<8x512xf32> to vector<8x128xf32>
    %141 = math.tanh %140 : vector<8x128xf32>
    %142 = vector.extract_strided_slice %127 {offsets = [0, 384], sizes = [8, 128], strides = [1, 1]} : vector<8x512xf32> to vector<8x128xf32>
    %143 = arith.negf %142 : vector<8x128xf32>
    %144 = math.exp %143 : vector<8x128xf32>
    %cst_40 = arith.constant 1.000000e+00 : f32
    %145 = vector.broadcast %cst_40 : f32 to vector<8x128xf32>
    %146 = arith.addf %145, %144 : vector<8x128xf32>
    %147 = arith.divf %145, %146 : vector<8x128xf32>
    %148 = arith.mulf %139, %114 : vector<8x128xf32>
    %149 = arith.mulf %133, %141 : vector<8x128xf32>
    %150 = arith.addf %148, %149 : vector<8x128xf32>
    %151 = math.tanh %150 : vector<8x128xf32>
    %152 = arith.mulf %147, %151 : vector<8x128xf32>
    %c4_i32 = arith.constant 4 : i32
    %153 = arith.addi %6, %c4_i32 : i32
    %154 = arith.index_cast %153 : i32 to index
    %c0_41 = arith.constant 0 : index
    %c0_42 = arith.constant 0 : index
    %155 = vector.load %arg2[%154, %c0_41, %c0_42] : memref<8x8x512xbf16, #tpu.memory_space<vmem>>, vector<1x8x512xbf16>
    %156 = vector.shape_cast %155 : vector<1x8x512xbf16> to vector<8x512xbf16>
    %157 = arith.extf %156 : vector<8x512xbf16> to vector<8x512xf32>
    %158 = vector.broadcast %3 : vector<1x512xf32> to vector<8x512xf32>
    %159 = arith.addf %157, %158 : vector<8x512xf32>
    %160 = arith.truncf %152 : vector<8x128xf32> to vector<8x128xbf16>
    %c0_43 = arith.constant 0 : index
    %c0_44 = arith.constant 0 : index
    %161 = vector.load %arg10[%c0_43, %c0_44] : memref<128x512xbf16, #tpu.memory_space<vmem>>, vector<128x512xbf16>
    %cst_45 = arith.constant dense<0.000000e+00> : vector<8x512xf32>
    %162 = tpu.matmul %160, %161, %cst_45 {dimension_numbers = #tpu.dot_dimension_numbers<[1], [0], [0], [1], [0, 0, 1, 1], [], []>} : vector<8x128xbf16>, vector<128x512xbf16>, vector<8x512xf32> -> vector<8x512xf32>
    %163 = arith.addf %159, %162 : vector<8x512xf32>
    %164 = vector.extract_strided_slice %163 {offsets = [0, 0], sizes = [8, 128], strides = [1, 1]} : vector<8x512xf32> to vector<8x128xf32>
    %165 = arith.negf %164 : vector<8x128xf32>
    %166 = math.exp %165 : vector<8x128xf32>
    %cst_46 = arith.constant 1.000000e+00 : f32
    %167 = vector.broadcast %cst_46 : f32 to vector<8x128xf32>
    %168 = arith.addf %167, %166 : vector<8x128xf32>
    %169 = arith.divf %167, %168 : vector<8x128xf32>
    %170 = vector.extract_strided_slice %163 {offsets = [0, 128], sizes = [8, 128], strides = [1, 1]} : vector<8x512xf32> to vector<8x128xf32>
    %171 = arith.negf %170 : vector<8x128xf32>
    %172 = math.exp %171 : vector<8x128xf32>
    %cst_47 = arith.constant 1.000000e+00 : f32
    %173 = vector.broadcast %cst_47 : f32 to vector<8x128xf32>
    %174 = arith.addf %173, %172 : vector<8x128xf32>
    %175 = arith.divf %173, %174 : vector<8x128xf32>
    %176 = vector.extract_strided_slice %163 {offsets = [0, 256], sizes = [8, 128], strides = [1, 1]} : vector<8x512xf32> to vector<8x128xf32>
    %177 = math.tanh %176 : vector<8x128xf32>
    %178 = vector.extract_strided_slice %163 {offsets = [0, 384], sizes = [8, 128], strides = [1, 1]} : vector<8x512xf32> to vector<8x128xf32>
    %179 = arith.negf %178 : vector<8x128xf32>
    %180 = math.exp %179 : vector<8x128xf32>
    %cst_48 = arith.constant 1.000000e+00 : f32
    %181 = vector.broadcast %cst_48 : f32 to vector<8x128xf32>
    %182 = arith.addf %181, %180 : vector<8x128xf32>
    %183 = arith.divf %181, %182 : vector<8x128xf32>
    %184 = arith.mulf %175, %150 : vector<8x128xf32>
    %185 = arith.mulf %169, %177 : vector<8x128xf32>
    %186 = arith.addf %184, %185 : vector<8x128xf32>
    %187 = math.tanh %186 : vector<8x128xf32>
    %188 = arith.mulf %183, %187 : vector<8x128xf32>
    %c5_i32 = arith.constant 5 : i32
    %189 = arith.addi %6, %c5_i32 : i32
    %190 = arith.index_cast %189 : i32 to index
    %c0_49 = arith.constant 0 : index
    %c0_50 = arith.constant 0 : index
    %191 = vector.load %arg2[%190, %c0_49, %c0_50] : memref<8x8x512xbf16, #tpu.memory_space<vmem>>, vector<1x8x512xbf16>
    %192 = vector.shape_cast %191 : vector<1x8x512xbf16> to vector<8x512xbf16>
    %193 = arith.extf %192 : vector<8x512xbf16> to vector<8x512xf32>
    %194 = vector.broadcast %3 : vector<1x512xf32> to vector<8x512xf32>
    %195 = arith.addf %193, %194 : vector<8x512xf32>
    %196 = arith.truncf %188 : vector<8x128xf32> to vector<8x128xbf16>
    %c0_51 = arith.constant 0 : index
    %c0_52 = arith.constant 0 : index
    %197 = vector.load %arg10[%c0_51, %c0_52] : memref<128x512xbf16, #tpu.memory_space<vmem>>, vector<128x512xbf16>
    %cst_53 = arith.constant dense<0.000000e+00> : vector<8x512xf32>
    %198 = tpu.matmul %196, %197, %cst_53 {dimension_numbers = #tpu.dot_dimension_numbers<[1], [0], [0], [1], [0, 0, 1, 1], [], []>} : vector<8x128xbf16>, vector<128x512xbf16>, vector<8x512xf32> -> vector<8x512xf32>
    %199 = arith.addf %195, %198 : vector<8x512xf32>
    %200 = vector.extract_strided_slice %199 {offsets = [0, 0], sizes = [8, 128], strides = [1, 1]} : vector<8x512xf32> to vector<8x128xf32>
    %201 = arith.negf %200 : vector<8x128xf32>
    %202 = math.exp %201 : vector<8x128xf32>
    %cst_54 = arith.constant 1.000000e+00 : f32
    %203 = vector.broadcast %cst_54 : f32 to vector<8x128xf32>
    %204 = arith.addf %203, %202 : vector<8x128xf32>
    %205 = arith.divf %203, %204 : vector<8x128xf32>
    %206 = vector.extract_strided_slice %199 {offsets = [0, 128], sizes = [8, 128], strides = [1, 1]} : vector<8x512xf32> to vector<8x128xf32>
    %207 = arith.negf %206 : vector<8x128xf32>
    %208 = math.exp %207 : vector<8x128xf32>
    %cst_55 = arith.constant 1.000000e+00 : f32
    %209 = vector.broadcast %cst_55 : f32 to vector<8x128xf32>
    %210 = arith.addf %209, %208 : vector<8x128xf32>
    %211 = arith.divf %209, %210 : vector<8x128xf32>
    %212 = vector.extract_strided_slice %199 {offsets = [0, 256], sizes = [8, 128], strides = [1, 1]} : vector<8x512xf32> to vector<8x128xf32>
    %213 = math.tanh %212 : vector<8x128xf32>
    %214 = vector.extract_strided_slice %199 {offsets = [0, 384], sizes = [8, 128], strides = [1, 1]} : vector<8x512xf32> to vector<8x128xf32>
    %215 = arith.negf %214 : vector<8x128xf32>
    %216 = math.exp %215 : vector<8x128xf32>
    %cst_56 = arith.constant 1.000000e+00 : f32
    %217 = vector.broadcast %cst_56 : f32 to vector<8x128xf32>
    %218 = arith.addf %217, %216 : vector<8x128xf32>
    %219 = arith.divf %217, %218 : vector<8x128xf32>
    %220 = arith.mulf %211, %186 : vector<8x128xf32>
    %221 = arith.mulf %205, %213 : vector<8x128xf32>
    %222 = arith.addf %220, %221 : vector<8x128xf32>
    %223 = math.tanh %222 : vector<8x128xf32>
    %224 = arith.mulf %219, %223 : vector<8x128xf32>
    %c6_i32 = arith.constant 6 : i32
    %225 = arith.addi %6, %c6_i32 : i32
    %226 = arith.index_cast %225 : i32 to index
    %c0_57 = arith.constant 0 : index
    %c0_58 = arith.constant 0 : index
    %227 = vector.load %arg2[%226, %c0_57, %c0_58] : memref<8x8x512xbf16, #tpu.memory_space<vmem>>, vector<1x8x512xbf16>
    %228 = vector.shape_cast %227 : vector<1x8x512xbf16> to vector<8x512xbf16>
    %229 = arith.extf %228 : vector<8x512xbf16> to vector<8x512xf32>
    %230 = vector.broadcast %3 : vector<1x512xf32> to vector<8x512xf32>
    %231 = arith.addf %229, %230 : vector<8x512xf32>
    %232 = arith.truncf %224 : vector<8x128xf32> to vector<8x128xbf16>
    %c0_59 = arith.constant 0 : index
    %c0_60 = arith.constant 0 : index
    %233 = vector.load %arg10[%c0_59, %c0_60] : memref<128x512xbf16, #tpu.memory_space<vmem>>, vector<128x512xbf16>
    %cst_61 = arith.constant dense<0.000000e+00> : vector<8x512xf32>
    %234 = tpu.matmul %232, %233, %cst_61 {dimension_numbers = #tpu.dot_dimension_numbers<[1], [0], [0], [1], [0, 0, 1, 1], [], []>} : vector<8x128xbf16>, vector<128x512xbf16>, vector<8x512xf32> -> vector<8x512xf32>
    %235 = arith.addf %231, %234 : vector<8x512xf32>
    %236 = vector.extract_strided_slice %235 {offsets = [0, 0], sizes = [8, 128], strides = [1, 1]} : vector<8x512xf32> to vector<8x128xf32>
    %237 = arith.negf %236 : vector<8x128xf32>
    %238 = math.exp %237 : vector<8x128xf32>
    %cst_62 = arith.constant 1.000000e+00 : f32
    %239 = vector.broadcast %cst_62 : f32 to vector<8x128xf32>
    %240 = arith.addf %239, %238 : vector<8x128xf32>
    %241 = arith.divf %239, %240 : vector<8x128xf32>
    %242 = vector.extract_strided_slice %235 {offsets = [0, 128], sizes = [8, 128], strides = [1, 1]} : vector<8x512xf32> to vector<8x128xf32>
    %243 = arith.negf %242 : vector<8x128xf32>
    %244 = math.exp %243 : vector<8x128xf32>
    %cst_63 = arith.constant 1.000000e+00 : f32
    %245 = vector.broadcast %cst_63 : f32 to vector<8x128xf32>
    %246 = arith.addf %245, %244 : vector<8x128xf32>
    %247 = arith.divf %245, %246 : vector<8x128xf32>
    %248 = vector.extract_strided_slice %235 {offsets = [0, 256], sizes = [8, 128], strides = [1, 1]} : vector<8x512xf32> to vector<8x128xf32>
    %249 = math.tanh %248 : vector<8x128xf32>
    %250 = vector.extract_strided_slice %235 {offsets = [0, 384], sizes = [8, 128], strides = [1, 1]} : vector<8x512xf32> to vector<8x128xf32>
    %251 = arith.negf %250 : vector<8x128xf32>
    %252 = math.exp %251 : vector<8x128xf32>
    %cst_64 = arith.constant 1.000000e+00 : f32
    %253 = vector.broadcast %cst_64 : f32 to vector<8x128xf32>
    %254 = arith.addf %253, %252 : vector<8x128xf32>
    %255 = arith.divf %253, %254 : vector<8x128xf32>
    %256 = arith.mulf %247, %222 : vector<8x128xf32>
    %257 = arith.mulf %241, %249 : vector<8x128xf32>
    %258 = arith.addf %256, %257 : vector<8x128xf32>
    %259 = math.tanh %258 : vector<8x128xf32>
    %260 = arith.mulf %255, %259 : vector<8x128xf32>
    %c7_i32 = arith.constant 7 : i32
    %261 = arith.addi %6, %c7_i32 : i32
    %262 = arith.index_cast %261 : i32 to index
    %c0_65 = arith.constant 0 : index
    %c0_66 = arith.constant 0 : index
    %263 = vector.load %arg2[%262, %c0_65, %c0_66] : memref<8x8x512xbf16, #tpu.memory_space<vmem>>, vector<1x8x512xbf16>
    %264 = vector.shape_cast %263 : vector<1x8x512xbf16> to vector<8x512xbf16>
    %265 = arith.extf %264 : vector<8x512xbf16> to vector<8x512xf32>
    %266 = vector.broadcast %3 : vector<1x512xf32> to vector<8x512xf32>
    %267 = arith.addf %265, %266 : vector<8x512xf32>
    %268 = arith.truncf %260 : vector<8x128xf32> to vector<8x128xbf16>
    %c0_67 = arith.constant 0 : index
    %c0_68 = arith.constant 0 : index
    %269 = vector.load %arg10[%c0_67, %c0_68] : memref<128x512xbf16, #tpu.memory_space<vmem>>, vector<128x512xbf16>
    %cst_69 = arith.constant dense<0.000000e+00> : vector<8x512xf32>
    %270 = tpu.matmul %268, %269, %cst_69 {dimension_numbers = #tpu.dot_dimension_numbers<[1], [0], [0], [1], [0, 0, 1, 1], [], []>} : vector<8x128xbf16>, vector<128x512xbf16>, vector<8x512xf32> -> vector<8x512xf32>
    %271 = arith.addf %267, %270 : vector<8x512xf32>
    %272 = vector.extract_strided_slice %271 {offsets = [0, 0], sizes = [8, 128], strides = [1, 1]} : vector<8x512xf32> to vector<8x128xf32>
    %273 = arith.negf %272 : vector<8x128xf32>
    %274 = math.exp %273 : vector<8x128xf32>
    %cst_70 = arith.constant 1.000000e+00 : f32
    %275 = vector.broadcast %cst_70 : f32 to vector<8x128xf32>
    %276 = arith.addf %275, %274 : vector<8x128xf32>
    %277 = arith.divf %275, %276 : vector<8x128xf32>
    %278 = vector.extract_strided_slice %271 {offsets = [0, 128], sizes = [8, 128], strides = [1, 1]} : vector<8x512xf32> to vector<8x128xf32>
    %279 = arith.negf %278 : vector<8x128xf32>
    %280 = math.exp %279 : vector<8x128xf32>
    %cst_71 = arith.constant 1.000000e+00 : f32
    %281 = vector.broadcast %cst_71 : f32 to vector<8x128xf32>
    %282 = arith.addf %281, %280 : vector<8x128xf32>
    %283 = arith.divf %281, %282 : vector<8x128xf32>
    %284 = vector.extract_strided_slice %271 {offsets = [0, 256], sizes = [8, 128], strides = [1, 1]} : vector<8x512xf32> to vector<8x128xf32>
    %285 = math.tanh %284 : vector<8x128xf32>
    %286 = vector.extract_strided_slice %271 {offsets = [0, 384], sizes = [8, 128], strides = [1, 1]} : vector<8x512xf32> to vector<8x128xf32>
    %287 = arith.negf %286 : vector<8x128xf32>
    %288 = math.exp %287 : vector<8x128xf32>
    %cst_72 = arith.constant 1.000000e+00 : f32
    %289 = vector.broadcast %cst_72 : f32 to vector<8x128xf32>
    %290 = arith.addf %289, %288 : vector<8x128xf32>
    %291 = arith.divf %289, %290 : vector<8x128xf32>
    %292 = arith.mulf %283, %258 : vector<8x128xf32>
    %293 = arith.mulf %277, %285 : vector<8x128xf32>
    %294 = arith.addf %292, %293 : vector<8x128xf32>
    %295 = math.tanh %294 : vector<8x128xf32>
    %296 = arith.mulf %291, %295 : vector<8x128xf32>
    %c0_73 = arith.constant 0 : index
    %c0_74 = arith.constant 0 : index
    %297 = vector.load %arg8[%c0_73, %c0_74] : memref<8x128xf32, #tpu.memory_space<vmem>>, vector<8x128xf32>
    tpu.vector_store %arg8[%c0_73, %c0_74], %296 {strides = array<i32>} : memref<8x128xf32, #tpu.memory_space<vmem>>, vector<8x128xf32>,
    %c0_75 = arith.constant 0 : index
    %c0_76 = arith.constant 0 : index
    %298 = vector.load %arg9[%c0_75, %c0_76] : memref<8x128xf32, #tpu.memory_space<vmem>>, vector<8x128xf32>
    tpu.vector_store %arg9[%c0_75, %c0_76], %294 {strides = array<i32>} : memref<8x128xf32, #tpu.memory_space<vmem>>, vector<8x128xf32>,
    %c1_i32_77 = arith.constant 1 : i32
    %c0_i32_78 = arith.constant 0 : i32
    %299 = arith.cmpi eq, %arg1, %c0_i32_78 : i32
    %300 = arith.extui %299 : i1 to i32
    %c0_i32_79 = arith.constant 0 : i32
    %301 = arith.cmpi ne, %300, %c0_i32_79 : i32
    scf.if %301 {
      %c0_80 = arith.constant 0 : index
      %c0_81 = arith.constant 0 : index
      %302 = vector.load %arg8[%c0_80, %c0_81] : memref<8x128xf32, #tpu.memory_space<vmem>>, vector<8x128xf32>
      %303 = arith.truncf %302 : vector<8x128xf32> to vector<8x128xbf16>
      %c0_82 = arith.constant 0 : index
      %c0_83 = arith.constant 0 : index
      %304 = vector.load %arg11[%c0_82, %c0_83] : memref<128x128xbf16, #tpu.memory_space<vmem>>, vector<128x128xbf16>
      %cst_84 = arith.constant dense<0.000000e+00> : vector<8x128xf32>
      %305 = tpu.matmul %303, %304, %cst_84 {dimension_numbers = #tpu.dot_dimension_numbers<[1], [0], [0], [1], [0, 0, 1, 1], [], []>} : vector<8x128xbf16>, vector<128x128xbf16>, vector<8x128xf32> -> vector<8x128xf32>
      %c0_85 = arith.constant 0 : index
      %c0_86 = arith.constant 0 : index
      %306 = vector.load %arg4[%c0_85, %c0_86] : memref<1x128xf32, #tpu.memory_space<vmem>>, vector<1x128xf32>
      %307 = vector.broadcast %306 : vector<1x128xf32> to vector<8x128xf32>
      %308 = arith.addf %305, %307 : vector<8x128xf32>
      %c0_87 = arith.constant 0 : index
      %c0_88 = arith.constant 0 : index
      %309 = vector.load %arg7[%c0_87, %c0_88] : memref<8x128xf32, #tpu.memory_space<vmem>>, vector<8x128xf32>
      tpu.vector_store %arg7[%c0_87, %c0_88], %308 {strides = array<i32>} : memref<8x128xf32, #tpu.memory_space<vmem>>, vector<8x128xf32>,
    } else {
    }
    return
  }
  func.func @transform_0(%arg0: i32, %arg1: i32) -> (i32, i32, i32) {
    %c0_i32 = arith.constant 0 : i32
    %c0_i32_0 = arith.constant 0 : i32
    return %arg1, %arg0, %c0_i32 : i32, i32, i32
  }
  func.func @transform_1(%arg0: i32, %arg1: i32) -> (i32, i32) {
    %c0_i32 = arith.constant 0 : i32
    %c0_i32_0 = arith.constant 0 : i32
    %c0_i32_1 = arith.constant 0 : i32
    return %c0_i32, %c0_i32_0 : i32, i32
  }
  func.func @transform_2(%arg0: i32, %arg1: i32) -> (i32, i32) {
    %c0_i32 = arith.constant 0 : i32
    %c0_i32_0 = arith.constant 0 : i32
    %c0_i32_1 = arith.constant 0 : i32
    return %c0_i32, %c0_i32_0 : i32, i32
  }
  func.func @transform_5(%arg0: i32, %arg1: i32) -> (i32, i32) {
    %c0_i32 = arith.constant 0 : i32
    %c0_i32_0 = arith.constant 0 : i32
    return %arg0, %c0_i32 : i32, i32
  }
}

</mosaic_0001>

<bundles_post_ra>
// kernel: lstm_network_forward.1
= control target key start
LH: loop header
LB: loop body
LE: loop exit
PB: predicated region body
PF: predicated region fallthrough
CT: control target
= control target key end

     0   :  { %s2485_s0 = inlined_call_operand.vmem [shape: bf16[8,8,512], index: 0, kind: input, shape index: {}]   ;;  %s2486_s1 = inlined_call_operand.vmem [shape: f32[1,512], index: 1, kind: input, shape index: {}]   ;;  %s2487_s2 = inlined_call_operand.vmem [shape: f32[1,128], index: 2, kind: input, shape index: {}]   ;;  %s2488_s3 = inlined_call_operand.vmem [shape: bf16[128,512], index: 3, kind: input, shape index: {}]   ;;  %s2489_s4 = inlined_call_operand.vmem [shape: bf16[128,128], index: 4, kind: input, shape index: {}]   ;;  %s2490_s5 = inlined_call_operand.vmem [shape: f32[8,128], index: 5, kind: output, shape index: {}]  }
   0x1   :  { %v1827_v0 = vld [vmem:[%s2488_s3] sm:$0xff]  ;;  %v1832_v1 = vld [vmem:[%s2488_s3 + $0x8] sm:$0xff]  ;;  %v1837_v2 = vld [vmem:[%s2488_s3 + $0x10] sm:$0xff] }
   0x2   :  { %v1842_v3 = vld [vmem:[%s2488_s3 + $0x18] sm:$0xff]  ;;  %v1847_v4 = vld [vmem:[%s2488_s3 + $0x20] sm:$0xff]  ;;  %v1852_v5 = vld [vmem:[%s2488_s3 + $0x28] sm:$0xff] }
   0x3   :  { %v1857_v6 = vld [vmem:[%s2488_s3 + $0x30] sm:$0xff]  ;;  %v1862_v7 = vld [vmem:[%s2488_s3 + $0x38] sm:$0xff]  ;;  %v1867_v8 = vld [vmem:[%s2488_s3 + $0x40] sm:$0xff] }
   0x4   :  { %v1872_v9 = vld [vmem:[%s2488_s3 + $0x48] sm:$0xff]  ;;  %v1877_v10 = vld [vmem:[%s2488_s3 + $0x50] sm:$0xff]  ;;  %v1882_v11 = vld [vmem:[%s2488_s3 + $0x58] sm:$0xff] }
   0x5   :  { %v1887_v12 = vld [vmem:[%s2488_s3 + $0x60] sm:$0xff]  ;;  %v1892_v13 = vld [vmem:[%s2488_s3 + $0x68] sm:$0xff]  ;;  %v1897_v14 = vld [vmem:[%s2488_s3 + $0x70] sm:$0xff] }
   0x6   :  { %v1902_v15 = vld [vmem:[%s2488_s3 + $0x78] sm:$0xff]  ;;  %v1907_v16 = vld [vmem:[%s2488_s3 + $0x80] sm:$0xff]  ;;  %v1912_v17 = vld [vmem:[%s2488_s3 + $0x88] sm:$0xff] }
   0x7   :  { %v1917_v18 = vld [vmem:[%s2488_s3 + $0x90] sm:$0xff]  ;;  %v1922_v19 = vld [vmem:[%s2488_s3 + $0x98] sm:$0xff]  ;;  %v94_v20 = vld [vmem:[%s2488_s3 + $0xa0] sm:$0xff] }
   0x8   :  { %v96_v21 = vld [vmem:[%s2488_s3 + $0xa8] sm:$0xff]  ;;  %v98_v22 = vld [vmem:[%s2488_s3 + $0xb0] sm:$0xff]  ;;  %v100_v23 = vld [vmem:[%s2488_s3 + $0xb8] sm:$0xff] }
   0x9   :  { %v102_v24 = vld [vmem:[%s2488_s3 + $0xc0] sm:$0xff]  ;;  %v104_v25 = vld [vmem:[%s2488_s3 + $0xc8] sm:$0xff]  ;;  %v106_v26 = vld [vmem:[%s2488_s3 + $0xd0] sm:$0xff] }
   0xa   :  { %v108_v27 = vld [vmem:[%s2488_s3 + $0xd8] sm:$0xff]  ;;  %v110_v28 = vld [vmem:[%s2488_s3 + $0xe0] sm:$0xff]  ;;  %v112_v29 = vld [vmem:[%s2488_s3 + $0xe8] sm:$0xff] }
   0xb   :  { %v114_v30 = vld [vmem:[%s2488_s3 + $0xf0] sm:$0xff]  ;;  %v116_v31 = vld [vmem:[%s2488_s3 + $0xf8] sm:$0xff] }
   0xc   :  { %125 = vsyncadd [#allocation6], 4096  ;;  %v160_v32 = vld [vmem:[%s2489_s4] sm:$0xff]  ;;  %v162_v33 = vld [vmem:[%s2489_s4 + $0x8] sm:$0xff] }
   0xd   :  { %161 = vst [vmem:[#allocation5] sm:$0xff] %v160_v32  ;;  %163 = vst [vmem:[#allocation5 + $0x8] sm:$0xff] %v162_v33  ;;  %v164_v34 = vld [vmem:[%s2489_s4 + $0x10] sm:$0xff]  ;;  %v166_v35 = vld [vmem:[%s2489_s4 + $0x18] sm:$0xff] }
   0xe   :  { %v168_v36 = vld [vmem:[%s2489_s4 + $0x20] sm:$0xff]  ;;  %165 = vst [vmem:[#allocation5 + $0x10] sm:$0xff] %v164_v34  ;;  %167 = vst [vmem:[#allocation5 + $0x18] sm:$0xff] %v166_v35  ;;  %v170_v37 = vld [vmem:[%s2489_s4 + $0x28] sm:$0xff] }
   0xf   :  { %169 = vst [vmem:[#allocation5 + $0x20] sm:$0xff] %v168_v36  ;;  %v172_v38 = vld [vmem:[%s2489_s4 + $0x30] sm:$0xff]  ;;  %v174_v39 = vld [vmem:[%s2489_s4 + $0x38] sm:$0xff]  ;;  %171 = vst [vmem:[#allocation5 + $0x28] sm:$0xff] %v170_v37 }
  0x10   :  { %173 = vst [vmem:[#allocation5 + $0x30] sm:$0xff] %v172_v38  ;;  %175 = vst [vmem:[#allocation5 + $0x38] sm:$0xff] %v174_v39 }
  0x11   :  { %183 = vsyncadd [#allocation6 + $0x1], 1024 }
  0x12   :  { %1786 = dma.done.wait [#allocation6], 4096 }
  0x13   :  { %1787 = vsyncadd [#allocation6], 4294963200  ;;  %v1984_v40 = vcombine.high %v110_v28, %v114_v30  ;;  %v1986_v41 = vcombine.low %v110_v28, %v114_v30  ;;  %v1988_v42 = vcombine.high %v102_v24, %v106_v26 }
  0x14   :  { %1788 = dma.done.wait [#allocation6 + $0x1], 1024 }
  0x15   :  { %1789 = vsyncadd [#allocation6 + $0x1], 4294966272  ;;  %v1990_v43 = vcombine.high %v112_v29, %v116_v31  ;;  %420 = vmatprep.subr.bf16.mxu0 %v1984_v40  ;;  %v1993_v44 = vcombine.low %v112_v29, %v116_v31  ;;  %v1995_v45 = vcombine.high %v104_v25, %v108_v27  ;;  %v1998_v46 = vcombine.low %v102_v24, %v106_v26 }
  0x16   :  { %421 = vmatpush1.bf16.msra.mxu0 %v1986_v41  ;;  %v2002_v47 = vcombine.high %v94_v20, %v98_v22  ;;  %v2005_v48 = vcombine.low %v104_v25, %v108_v27  ;;  %v2008_v49 = vcombine.high %v96_v21, %v100_v23  ;;  %v1790_v50 = vmov 0   ;;  %v197_v25 = vld [vmem:[%s2485_s0 + $0x8] sm:$0xff] }
  0x17   :  { %461 = vmatprep.subr.bf16.mxu1 %v1990_v43  ;;  %422 = vmatprep.subr.bf16.mxu0 %v1988_v42  ;;  %v2012_v51 = vcombine.low %v94_v20, %v98_v22  ;;  %v2017_v52 = vcombine.high %v1907_v16, %v1917_v18  ;;  %v2020_v53 = vcombine.low %v96_v21, %v100_v23  ;;  %v201_v33 = vunpack.c.h.bf16 %v197_v25 }
  0x18   :  { %462 = vmatpush1.bf16.msra.mxu1 %v1993_v44  ;;  %452 = vmatprep.mubr.bf16.mxu0 %v1790_v50  ;;  %v2025_v54 = vcombine.high %v1912_v17, %v1922_v19  ;;  %v2031_v55 = vcombine.low %v1907_v16, %v1917_v18  ;;  %v2036_v56 = vcombine.high %v1887_v12, %v1897_v14  ;;  %v200_v38 = vunpack.c.l.bf16 %v197_v25 }
  0x19   :  { %463 = vmatprep.subr.bf16.mxu1 %v1995_v45  ;;  %493 = vmatprep.mubr.bf16.mxu1 %v1790_v50  ;;  %v2041_v57 = vcombine.low %v1912_v17, %v1922_v19  ;;  %v2046_v58 = vcombine.high %v1892_v13, %v1902_v15  ;;  %v2051_v59 = vcombine.low %v1887_v12, %v1897_v14  ;;  %vm1793_vm0 = vmmov 0  }
  0x1a   :  { %423 = vmatpush1.bf16.msra.mxu0 %v1998_v46  ;;  %v2056_v60 = vcombine.high %v1867_v8, %v1877_v10  ;;  %v2061_v61 = vcombine.low %v1892_v13, %v1902_v15  ;;  %v2066_v62 = vcombine.high %v1872_v9, %v1882_v11  ;;  %v2071_v63 = vcombine.low %v1867_v8, %v1877_v10 }
  0x1b   :  { %424 = vmatprep.subr.bf16.mxu0 %v2002_v47  ;;  %v2076_v12 = vcombine.high %v1847_v4, %v1857_v6  ;;  %v2081_v13 = vcombine.low %v1872_v9, %v1882_v11  ;;  %v2086_v14 = vcombine.high %v1852_v5, %v1862_v7  ;;  %v2091_v8 = vcombine.low %v1847_v4, %v1857_v6  ;;  %v193_v6 = vld [vmem:[%s2486_s1] sm:$0xf] }
  0x1c   :  { %464 = vmatpush1.bf16.msra.mxu1 %v2005_v48  ;;  %v2096_v10 = vcombine.high %v1827_v0, %v1837_v2  ;;  %v2101_v9 = vcombine.low %v1852_v5, %v1862_v7  ;;  %v2106_v11 = vcombine.high %v1832_v1, %v1842_v3  ;;  %v2111_v4 = vcombine.low %v1827_v0, %v1837_v2  ;;  %v196_v7 = vld [vmem:[%s2485_s0] sm:$0xff] }
  0x1d   :  { %465 = vmatprep.subr.bf16.mxu1 %v2008_v49  ;;  %v2117_v5 = vcombine.low %v1832_v1, %v1842_v3  ;;  %v1791_v0 = vmov 0.0|0.0   ;;  %v203_v1 = vlaneseq  ;;  %v198_v16 = vunpack.c.l.bf16 %v196_v7 }
  0x1e   :  { %425 = vmatpush1.bf16.msra.mxu0 %v2012_v51  ;;  %v199_v18 = vunpack.c.h.bf16 %v196_v7 }
  0x1f   :  { %426 = vmatprep.subr.bf16.mxu0 %v2017_v52  ;;  %v204_v2 = vshrl.u32 %v203_v1, 7 }
  0x20   :  { %466 = vmatpush1.bf16.msra.mxu1 %v2020_v53 }
  0x21   :  { %467 = vmatprep.subr.bf16.mxu1 %v2025_v54  ;;  %v205_v3 = vsub.s32 0, %v204_v2  ;;  %v209_v15 = vsub.s32 1, %v204_v2  ;;  %v217_v23 = vsub.s32 3, %v204_v2  ;;  %v213_v30 = vsub.s32 2, %v204_v2 }
  0x22   :  { %427 = vmatpush1.bf16.msra.mxu0 %v2031_v55 }
  0x23   :  { %428 = vmatprep.subr.bf16.mxu0 %v2036_v56  ;;  %v2164_v17 = vrot.slane %v193_v6, %v205_v3  ;;  %v2166_v19 = vrot.slane %v193_v6, %v209_v15  ;;  %v2173_v34 = vrot.slane %v193_v6, %v217_v23  ;;  %v2175_v39 = vrot.slane %v193_v6, %v213_v30 }
  0x24   :  { %468 = vmatpush1.bf16.msra.mxu1 %v2041_v57 }
  0x25   :  { %469 = vmatprep.subr.bf16.mxu1 %v2046_v58  ;;  %v223_v20 = vadd.f32 %v2164_v17, %v198_v16  ;;  %v224_v21 = vadd.f32 %v2166_v19, %v199_v18  ;;  %v226_v1 = vadd.f32 %v2173_v34, %v201_v33  ;;  %v225_v3 = vadd.f32 %v2175_v39, %v200_v38  ;;  %v1571_v33 = vld [vmem:[%s2485_s0 + $0x10] sm:$0xff] }
  0x26   :  { %429 = vmatpush1.bf16.msra.mxu0 %v2051_v59 }
  0x27   :  { %430 = vmatprep.subr.bf16.mxu0 %v2056_v60 }
  0x28   :  { %470 = vmatpush1.bf16.msra.mxu1 %v2061_v61 }
  0x29   :  { %471 = vmatprep.subr.bf16.mxu1 %v2066_v62 }
  0x2a   :  { %431 = vmatpush1.bf16.msra.mxu0 %v2071_v63 }
  0x2b   :  { %432 = vmatprep.subr.bf16.mxu0 %v2076_v12 }
  0x2c   :  { %472 = vmatpush1.bf16.msra.mxu1 %v2081_v13 }
  0x2d   :  { %473 = vmatprep.subr.bf16.mxu1 %v2086_v14 }
  0x2e   :  { %433 = vmatpush1.bf16.msra.mxu0 %v2091_v8 }
  0x2f   :  { %434 = vmatprep.subr.bf16.mxu0 %v2096_v10 }
  0x30   :  { %474 = vmatpush1.bf16.msra.mxu1 %v2101_v9 }
  0x31   :  { %475 = vmatprep.subr.bf16.mxu1 %v2106_v11 }
  0x32   :  { %435 = vmatpush1.bf16.msra.mxu0 %v2111_v4 }
  0x33   :  { %542 = vmatprep.subr.bf16.mxu0 %v1984_v40 }
  0x34   :  { %476 = vmatpush1.bf16.msra.mxu1 %v2117_v5 }
  0x35   :  { %583 = vmatprep.subr.bf16.mxu1 %v1990_v43  ;;  %453 = vmatmul.mubr.bf16.vlgmr.msra.gmra.mxu0 %v1791_v0 }
  0x36   :  { %543 = vmatpush1.bf16.msra.mxu0 %v1986_v41  ;;  %574 = vmatprep.mubr.bf16.mxu0 %v1790_v50 }
  0x37   :  { %494 = vmatmul.mubr.bf16.vlgmr.msra.gmra.mxu1 %v1791_v0  ;;  %544 = vmatprep.subr.bf16.mxu0 %v1988_v42 }
  0x38   :  { %584 = vmatpush1.bf16.msra.mxu1 %v1993_v44  ;;  %615 = vmatprep.mubr.bf16.mxu1 %v1790_v50 }
  0x39   :  { %585 = vmatprep.subr.bf16.mxu1 %v1995_v45 }
  0x3a   :  { %545 = vmatpush1.bf16.msra.mxu0 %v1998_v46 }
  0x3b   :  { %546 = vmatprep.subr.bf16.mxu0 %v2002_v47 }
  0x3c   :  { %586 = vmatpush1.bf16.msra.mxu1 %v2005_v48 }
  0x3d   :  { %587 = vmatprep.subr.bf16.mxu1 %v2008_v49 }
  0x3e   :  { %547 = vmatpush1.bf16.msra.mxu0 %v2012_v51 }
  0x3f   :  { %548 = vmatprep.subr.bf16.mxu0 %v2017_v52 }
  0x40   :  { %588 = vmatpush1.bf16.msra.mxu1 %v2020_v53 }
  0x41   :  { %589 = vmatprep.subr.bf16.mxu1 %v2025_v54 }
  0x42   :  { %549 = vmatpush1.bf16.msra.mxu0 %v2031_v55 }
  0x43   :  { %550 = vmatprep.subr.bf16.mxu0 %v2036_v56 }
  0x44   :  { %590 = vmatpush1.bf16.msra.mxu1 %v2041_v57 }
  0x45   :  { %591 = vmatprep.subr.bf16.mxu1 %v2046_v58 }
  0x46   :  { %551 = vmatpush1.bf16.msra.mxu0 %v2051_v59 }
  0x47   :  { %552 = vmatprep.subr.bf16.mxu0 %v2056_v60 }
  0x48   :  { %592 = vmatpush1.bf16.msra.mxu1 %v2061_v61 }
  0x49   :  { %593 = vmatprep.subr.bf16.mxu1 %v2066_v62 }
  0x4a   :  { %553 = vmatpush1.bf16.msra.mxu0 %v2071_v63 }
  0x4b   :  { %554 = vmatprep.subr.bf16.mxu0 %v2076_v12 }
  0x4c   :  { %594 = vmatpush1.bf16.msra.mxu1 %v2081_v13 }
  0x4d   :  { %595 = vmatprep.subr.bf16.mxu1 %v2086_v14 }
  0x4e   :  { %555 = vmatpush1.bf16.msra.mxu0 %v2091_v8 }
  0x4f   :  { %556 = vmatprep.subr.bf16.mxu0 %v2096_v10 }
  0x50   :  { %596 = vmatpush1.bf16.msra.mxu1 %v2101_v9 }
  0x51   :  { %597 = vmatprep.subr.bf16.mxu1 %v2106_v11 }
  0x52   :  { %557 = vmatpush1.bf16.msra.mxu0 %v2111_v4 }
  0x53   :  { %664 = vmatprep.subr.bf16.mxu0 %v1984_v40 }
  0x54   :  { %598 = vmatpush1.bf16.msra.mxu1 %v2117_v5 }
  0x55   :  { %705 = vmatprep.subr.bf16.mxu1 %v1990_v43 }
  0xf5   :  { %v454_v22 = vpop.f32.mrf.mxu0 }
  0xf6   :  { %v502_v24 = vadd.f32 %v454_v22, %v223_v20 }
  0xf7   :  { %v495_v26 = vpop.f32.mrf.mxu1  ;;  %v456_v27 = vpop.f32.mrf.mxu0 }
  0xf8   :  { %v1568_v28 = vmul.f32 -1.442695, %v502_v24  ;;  %v503_v29 = vadd.f32 %v456_v27, %v224_v21  ;;  %v504_v2 = vadd.f32 %v495_v26, %v225_v3 }
  0xf9   :  { %v497_v31 = vpop.f32.mrf.mxu1  ;;  %v458_v32 = vpop.f32.mrf.mxu0 }
  0xfa   :  { %1658 = vpow2.f32 %v1568_v28  ;;  %v1569_v35 = vmul.f32 -1.442695, %v503_v29  ;;  %v505_v7 = vadd.f32 %v497_v31, %v226_v1 }
  0xfb   :  { %v499_v36 = vpop.f32.mrf.mxu1  ;;  %v459_v37 = vpop.f32.mrf.mxu0 }
  0xfc   :  { %1660 = vpow2.f32 %v1569_v35  ;;  %v1570_v15 = vmul.f32 -1.442695, %v505_v7  ;;  %v533_v35 = vunpack.c.l.bf16 %v1571_v33  ;;  %v534_v36 = vunpack.c.h.bf16 %v1571_v33 }
  0xfd   :  { %v500_v0 = vpop.f32.mrf.mxu1  ;;  %1662 = vtanh.f32 %v504_v2 }
  0xfe   :  { %1664 = vpow2.f32 %v1570_v15  ;;  %v537_v37 = vadd.f32 %v533_v35, %v2164_v17  ;;  %v538_v38 = vadd.f32 %v534_v36, %v2166_v19 }
 0x107   :  { %v1659_v16 = vpop.eup %1658 }
 0x108   :  { %v509_v18 = vadd.f32 1.0, %v1659_v16  ;;  %v1572_v16 = vld [vmem:[%s2485_s0 + $0x18] sm:$0xff] }
 0x109   :  { %v1661_v20 = vpop.eup %1660 }
 0x10a   :  { %1666 = vrcp.f32 %v509_v18  ;;  %v515_v21 = vadd.f32 1.0, %v1661_v20  ;;  %v1663_v22 = vpop.eup %1662  ;;  %v536_v20 = vunpack.c.h.bf16 %v1572_v16 }
 0x10b   :  { %v1665_v23 = vpop.eup %1664 }
 0x10c   :  { %1668 = vrcp.f32 %v515_v21  ;;  %v522_v25 = vadd.f32 1.0, %v1665_v23 }
 0x10e   :  { %1670 = vrcp.f32 %v522_v25  ;;  %v540_v25 = vadd.f32 %v536_v20, %v2173_v34 }
 0x117   :  { %v1667_v6 = vpop.eup %1666 }
 0x118   :  { %v526_v28 = vmul.f32 %v1667_v6, %v1663_v22 }
 0x119   :  { %v1669_v24 = vpop.eup %1668 }
 0x11a   :  { %v525_v27 = vmul.f32 0.0, %v1669_v24 }
 0x11b   :  { %v1671_v26 = vpop.eup %1670 }
 0x11c   :  { %v2179_v29 = vadd.f32 %v526_v28, %v525_v27  ;;  %v535_v27 = vunpack.c.l.bf16 %v1572_v16 }
 0x11e   :  { %1672 = vtanh.f32 %v2179_v29 }
 0x12b   :  { %v1673_v30 = vpop.eup %1672 }
 0x12c   :  { %v529_v31 = vmul.f32 %v1673_v30, %v1671_v26  ;;  %v539_v26 = vadd.f32 %v535_v27, %v2175_v39 }
 0x12e   :  { %v541_v32 = vpack.c.bf16 %v529_v31, %v529_v31 }
 0x130   :  { %575 = vmatmul.mubr.bf16.vlgmr.msra.gmra.mxu0 %v541_v32  ;;  %616 = vmatmul.mubr.bf16.vlgmr.msra.gmra.mxu1 %v541_v32 }
 0x131   :  { %665 = vmatpush1.bf16.msra.mxu0 %v1986_v41  ;;  %706 = vmatpush1.bf16.msra.mxu1 %v1993_v44 }
 0x132   :  { %666 = vmatprep.subr.bf16.mxu0 %v1988_v42  ;;  %707 = vmatprep.subr.bf16.mxu1 %v1995_v45 }
 0x133   :  { %696 = vmatprep.mubr.bf16.mxu0 %v1790_v50  ;;  %737 = vmatprep.mubr.bf16.mxu1 %v1790_v50 }
 0x135   :  { %667 = vmatpush1.bf16.msra.mxu0 %v1998_v46  ;;  %708 = vmatpush1.bf16.msra.mxu1 %v2005_v48 }
 0x136   :  { %668 = vmatprep.subr.bf16.mxu0 %v2002_v47  ;;  %709 = vmatprep.subr.bf16.mxu1 %v2008_v49 }
 0x139   :  { %669 = vmatpush1.bf16.msra.mxu0 %v2012_v51  ;;  %710 = vmatpush1.bf16.msra.mxu1 %v2020_v53 }
 0x13a   :  { %670 = vmatprep.subr.bf16.mxu0 %v2017_v52  ;;  %711 = vmatprep.subr.bf16.mxu1 %v2025_v54 }
 0x13d   :  { %671 = vmatpush1.bf16.msra.mxu0 %v2031_v55  ;;  %712 = vmatpush1.bf16.msra.mxu1 %v2041_v57 }
 0x13e   :  { %672 = vmatprep.subr.bf16.mxu0 %v2036_v56  ;;  %713 = vmatprep.subr.bf16.mxu1 %v2046_v58 }
 0x141   :  { %673 = vmatpush1.bf16.msra.mxu0 %v2051_v59  ;;  %714 = vmatpush1.bf16.msra.mxu1 %v2061_v61 }
 0x142   :  { %674 = vmatprep.subr.bf16.mxu0 %v2056_v60  ;;  %715 = vmatprep.subr.bf16.mxu1 %v2066_v62 }
 0x145   :  { %675 = vmatpush1.bf16.msra.mxu0 %v2071_v63  ;;  %716 = vmatpush1.bf16.msra.mxu1 %v2081_v13 }
 0x146   :  { %676 = vmatprep.subr.bf16.mxu0 %v2076_v12  ;;  %717 = vmatprep.subr.bf16.mxu1 %v2086_v14 }
 0x149   :  { %677 = vmatpush1.bf16.msra.mxu0 %v2091_v8  ;;  %718 = vmatpush1.bf16.msra.mxu1 %v2101_v9 }
 0x14a   :  { %678 = vmatprep.subr.bf16.mxu0 %v2096_v10  ;;  %719 = vmatprep.subr.bf16.mxu1 %v2106_v11 }
 0x14d   :  { %679 = vmatpush1.bf16.msra.mxu0 %v2111_v4  ;;  %720 = vmatpush1.bf16.msra.mxu1 %v2117_v5 }
 0x14e   :  { %786 = vmatprep.subr.bf16.mxu0 %v1984_v40  ;;  %827 = vmatprep.subr.bf16.mxu1 %v1990_v43 }
 0x1f0   :  { %v576_v0 = vpop.f32.mrf.mxu0  ;;  %v617_v1 = vpop.f32.mrf.mxu1 }
 0x1f1   :  { %v624_v3 = vadd.f32 %v576_v0, %v537_v37  ;;  %v626_v32 = vadd.f32 %v617_v1, %v539_v26 }
 0x1f2   :  { %v578_v7 = vpop.f32.mrf.mxu0  ;;  %v619_v2 = vpop.f32.mrf.mxu1 }
 0x1f3   :  { %v1573_v15 = vmul.f32 -1.442695, %v624_v3  ;;  %v625_v18 = vadd.f32 %v578_v7, %v538_v38  ;;  %v627_v28 = vadd.f32 %v619_v2, %v540_v25 }
 0x1f4   :  { %v580_v21 = vpop.f32.mrf.mxu0  ;;  %v621_v22 = vpop.f32.mrf.mxu1 }
 0x1f5   :  { %1674 = vpow2.f32 %v1573_v15  ;;  %v1574_v23 = vmul.f32 -1.442695, %v625_v18  ;;  %v1575_v30 = vmul.f32 -1.442695, %v627_v28 }
 0x1f6   :  { %v581_v6 = vpop.f32.mrf.mxu0  ;;  %v622_v24 = vpop.f32.mrf.mxu1 }
 0x1f7   :  { %1676 = vpow2.f32 %v1574_v23 }
 0x1f8   :  { %1678 = vpow2.f32 %v1575_v30 }
 0x202   :  { %v1675_v31 = vpop.eup %1674 }
 0x203   :  { %v631_v33 = vadd.f32 1.0, %v1675_v31 }
 0x204   :  { %v1677_v35 = vpop.eup %1676 }
 0x205   :  { %1680 = vrcp.f32 %v631_v33  ;;  %v637_v36 = vadd.f32 1.0, %v1677_v35  ;;  %v1679_v37 = vpop.eup %1678 }
 0x206   :  { %1682 = vtanh.f32 %v626_v32  ;;  %v644_v7 = vadd.f32 1.0, %v1679_v37  ;;  %v1577_v32 = vld [vmem:[%s2485_s0 + $0x28] sm:$0xff] }
 0x207   :  { %1684 = vrcp.f32 %v637_v36  ;;  %v658_v35 = vunpack.c.h.bf16 %v1577_v32 }
 0x208   :  { %1686 = vrcp.f32 %v644_v7 }
 0x209   :  { %v662_v7 = vadd.f32 %v658_v35, %v2173_v34 }
 0x212   :  { %v1681_v38 = vpop.eup %1680 }
 0x213   :  { %v1683_v0 = vpop.eup %1682 }
 0x214   :  { %v1685_v3 = vpop.eup %1684  ;;  %v648_v15 = vmul.f32 %v1683_v0, %v1681_v38 }
 0x215   :  { %v647_v2 = vmul.f32 %v1685_v3, %v2179_v29  ;;  %v1687_v1 = vpop.eup %1686  ;;  %v1576_v29 = vld [vmem:[%s2485_s0 + $0x20] sm:$0xff] }
 0x216   :  { %v655_v22 = vunpack.c.l.bf16 %v1576_v29  ;;  %v656_v23 = vunpack.c.h.bf16 %v1576_v29 }
 0x217   :  { %v2227_v16 = vadd.f32 %v648_v15, %v647_v2  ;;  %v657_v15 = vunpack.c.l.bf16 %v1577_v32 }
 0x218   :  { %v659_v6 = vadd.f32 %v655_v22, %v2164_v17  ;;  %v660_v24 = vadd.f32 %v656_v23, %v2166_v19 }
 0x219   :  { %1688 = vtanh.f32 %v2227_v16 }
 0x226   :  { %v1689_v18 = vpop.eup %1688 }
 0x227   :  { %v651_v20 = vmul.f32 %v1689_v18, %v1687_v1  ;;  %v661_v1 = vadd.f32 %v657_v15, %v2175_v39 }
 0x229   :  { %v663_v21 = vpack.c.bf16 %v651_v20, %v651_v20 }
 0x22b   :  { %697 = vmatmul.mubr.bf16.vlgmr.msra.gmra.mxu0 %v663_v21  ;;  %738 = vmatmul.mubr.bf16.vlgmr.msra.gmra.mxu1 %v663_v21 }
 0x22c   :  { %787 = vmatpush1.bf16.msra.mxu0 %v1986_v41  ;;  %828 = vmatpush1.bf16.msra.mxu1 %v1993_v44 }
 0x22d   :  { %788 = vmatprep.subr.bf16.mxu0 %v1988_v42  ;;  %829 = vmatprep.subr.bf16.mxu1 %v1995_v45 }
 0x22e   :  { %818 = vmatprep.mubr.bf16.mxu0 %v1790_v50  ;;  %859 = vmatprep.mubr.bf16.mxu1 %v1790_v50 }
 0x230   :  { %789 = vmatpush1.bf16.msra.mxu0 %v1998_v46  ;;  %830 = vmatpush1.bf16.msra.mxu1 %v2005_v48 }
 0x231   :  { %790 = vmatprep.subr.bf16.mxu0 %v2002_v47  ;;  %831 = vmatprep.subr.bf16.mxu1 %v2008_v49 }
 0x234   :  { %791 = vmatpush1.bf16.msra.mxu0 %v2012_v51  ;;  %832 = vmatpush1.bf16.msra.mxu1 %v2020_v53 }
 0x235   :  { %792 = vmatprep.subr.bf16.mxu0 %v2017_v52  ;;  %833 = vmatprep.subr.bf16.mxu1 %v2025_v54 }
 0x238   :  { %793 = vmatpush1.bf16.msra.mxu0 %v2031_v55  ;;  %834 = vmatpush1.bf16.msra.mxu1 %v2041_v57 }
 0x239   :  { %794 = vmatprep.subr.bf16.mxu0 %v2036_v56  ;;  %835 = vmatprep.subr.bf16.mxu1 %v2046_v58 }
 0x23c   :  { %795 = vmatpush1.bf16.msra.mxu0 %v2051_v59  ;;  %836 = vmatpush1.bf16.msra.mxu1 %v2061_v61 }
 0x23d   :  { %796 = vmatprep.subr.bf16.mxu0 %v2056_v60  ;;  %837 = vmatprep.subr.bf16.mxu1 %v2066_v62 }
 0x240   :  { %797 = vmatpush1.bf16.msra.mxu0 %v2071_v63  ;;  %838 = vmatpush1.bf16.msra.mxu1 %v2081_v13 }
 0x241   :  { %798 = vmatprep.subr.bf16.mxu0 %v2076_v12  ;;  %839 = vmatprep.subr.bf16.mxu1 %v2086_v14 }
 0x244   :  { %799 = vmatpush1.bf16.msra.mxu0 %v2091_v8  ;;  %840 = vmatpush1.bf16.msra.mxu1 %v2101_v9 }
 0x245   :  { %800 = vmatprep.subr.bf16.mxu0 %v2096_v10  ;;  %841 = vmatprep.subr.bf16.mxu1 %v2106_v11 }
 0x248   :  { %801 = vmatpush1.bf16.msra.mxu0 %v2111_v4  ;;  %842 = vmatpush1.bf16.msra.mxu1 %v2117_v5 }
 0x249   :  { %908 = vmatprep.subr.bf16.mxu0 %v1984_v40  ;;  %949 = vmatprep.subr.bf16.mxu1 %v1990_v43 }
 0x2eb   :  { %v698_v25 = vpop.f32.mrf.mxu0  ;;  %v739_v27 = vpop.f32.mrf.mxu1 }
 0x2ec   :  { %v746_v28 = vadd.f32 %v698_v25, %v659_v6  ;;  %v748_v21 = vadd.f32 %v739_v27, %v661_v1 }
 0x2ed   :  { %v700_v26 = vpop.f32.mrf.mxu0  ;;  %v741_v30 = vpop.f32.mrf.mxu1 }
 0x2ee   :  { %v1578_v31 = vmul.f32 -1.442695, %v746_v28  ;;  %v747_v33 = vadd.f32 %v700_v26, %v660_v24  ;;  %v749_v2 = vadd.f32 %v741_v30, %v662_v7 }
 0x2ef   :  { %v702_v36 = vpop.f32.mrf.mxu0  ;;  %v743_v37 = vpop.f32.mrf.mxu1 }
 0x2f0   :  { %1690 = vpow2.f32 %v1578_v31  ;;  %v1579_v38 = vmul.f32 -1.442695, %v747_v33  ;;  %v1580_v18 = vmul.f32 -1.442695, %v749_v2 }
 0x2f1   :  { %v703_v0 = vpop.f32.mrf.mxu0  ;;  %v744_v3 = vpop.f32.mrf.mxu1 }
 0x2f2   :  { %1692 = vpow2.f32 %v1579_v38 }
 0x2f3   :  { %1694 = vpow2.f32 %v1580_v18 }
 0x2fd   :  { %v1691_v20 = vpop.eup %1690 }
 0x2fe   :  { %v753_v29 = vadd.f32 1.0, %v1691_v20 }
 0x2ff   :  { %v1693_v22 = vpop.eup %1692 }
 0x300   :  { %1696 = vrcp.f32 %v753_v29  ;;  %v759_v23 = vadd.f32 1.0, %v1693_v22  ;;  %v1695_v6 = vpop.eup %1694 }
 0x301   :  { %1698 = vtanh.f32 %v748_v21  ;;  %v766_v26 = vadd.f32 1.0, %v1695_v6  ;;  %v1582_v21 = vld [vmem:[%s2485_s0 + $0x38] sm:$0xff] }
 0x302   :  { %1700 = vrcp.f32 %v759_v23  ;;  %v780_v22 = vunpack.c.h.bf16 %v1582_v21 }
 0x303   :  { %1702 = vrcp.f32 %v766_v26 }
 0x304   :  { %v784_v26 = vadd.f32 %v780_v22, %v2173_v34 }
 0x30d   :  { %v1697_v24 = vpop.eup %1696 }
 0x30e   :  { %v1699_v25 = vpop.eup %1698 }
 0x30f   :  { %v1701_v28 = vpop.eup %1700  ;;  %v770_v31 = vmul.f32 %v1699_v25, %v1697_v24 }
 0x310   :  { %v769_v30 = vmul.f32 %v1701_v28, %v2227_v16  ;;  %v1703_v27 = vpop.eup %1702  ;;  %v1581_v16 = vld [vmem:[%s2485_s0 + $0x30] sm:$0xff] }
 0x311   :  { %v777_v37 = vunpack.c.l.bf16 %v1581_v16  ;;  %v778_v38 = vunpack.c.h.bf16 %v1581_v16 }
 0x312   :  { %v2275_v32 = vadd.f32 %v770_v31, %v769_v30  ;;  %v779_v31 = vunpack.c.l.bf16 %v1582_v21 }
 0x313   :  { %v781_v0 = vadd.f32 %v777_v37, %v2164_v17  ;;  %v782_v3 = vadd.f32 %v778_v38, %v2166_v19 }
 0x314   :  { %1704 = vtanh.f32 %v2275_v32 }
 0x321   :  { %v1705_v33 = vpop.eup %1704 }
 0x322   :  { %v773_v35 = vmul.f32 %v1705_v33, %v1703_v27  ;;  %v783_v27 = vadd.f32 %v779_v31, %v2175_v39 }
 0x324   :  { %v785_v36 = vpack.c.bf16 %v773_v35, %v773_v35 }
 0x326   :  { %819 = vmatmul.mubr.bf16.vlgmr.msra.gmra.mxu0 %v785_v36  ;;  %860 = vmatmul.mubr.bf16.vlgmr.msra.gmra.mxu1 %v785_v36 }
 0x327   :  { %909 = vmatpush1.bf16.msra.mxu0 %v1986_v41  ;;  %950 = vmatpush1.bf16.msra.mxu1 %v1993_v44 }
 0x328   :  { %910 = vmatprep.subr.bf16.mxu0 %v1988_v42  ;;  %951 = vmatprep.subr.bf16.mxu1 %v1995_v45 }
 0x329   :  { %940 = vmatprep.mubr.bf16.mxu0 %v1790_v50  ;;  %981 = vmatprep.mubr.bf16.mxu1 %v1790_v50 }
 0x32b   :  { %911 = vmatpush1.bf16.msra.mxu0 %v1998_v46  ;;  %952 = vmatpush1.bf16.msra.mxu1 %v2005_v48 }
 0x32c   :  { %912 = vmatprep.subr.bf16.mxu0 %v2002_v47  ;;  %953 = vmatprep.subr.bf16.mxu1 %v2008_v49 }
 0x32f   :  { %913 = vmatpush1.bf16.msra.mxu0 %v2012_v51  ;;  %954 = vmatpush1.bf16.msra.mxu1 %v2020_v53 }
 0x330   :  { %914 = vmatprep.subr.bf16.mxu0 %v2017_v52  ;;  %955 = vmatprep.subr.bf16.mxu1 %v2025_v54 }
 0x333   :  { %915 = vmatpush1.bf16.msra.mxu0 %v2031_v55  ;;  %956 = vmatpush1.bf16.msra.mxu1 %v2041_v57 }
 0x334   :  { %916 = vmatprep.subr.bf16.mxu0 %v2036_v56  ;;  %957 = vmatprep.subr.bf16.mxu1 %v2046_v58 }
 0x337   :  { %917 = vmatpush1.bf16.msra.mxu0 %v2051_v59  ;;  %958 = vmatpush1.bf16.msra.mxu1 %v2061_v61 }
 0x338   :  { %918 = vmatprep.subr.bf16.mxu0 %v2056_v60  ;;  %959 = vmatprep.subr.bf16.mxu1 %v2066_v62 }
 0x33b   :  { %919 = vmatpush1.bf16.msra.mxu0 %v2071_v63  ;;  %960 = vmatpush1.bf16.msra.mxu1 %v2081_v13 }
 0x33c   :  { %920 = vmatprep.subr.bf16.mxu0 %v2076_v12  ;;  %961 = vmatprep.subr.bf16.mxu1 %v2086_v14 }
 0x33f   :  { %921 = vmatpush1.bf16.msra.mxu0 %v2091_v8  ;;  %962 = vmatpush1.bf16.msra.mxu1 %v2101_v9 }
 0x340   :  { %922 = vmatprep.subr.bf16.mxu0 %v2096_v10  ;;  %963 = vmatprep.subr.bf16.mxu1 %v2106_v11 }
 0x343   :  { %923 = vmatpush1.bf16.msra.mxu0 %v2111_v4  ;;  %964 = vmatpush1.bf16.msra.mxu1 %v2117_v5 }
 0x344   :  { %1030 = vmatprep.subr.bf16.mxu0 %v1984_v40  ;;  %1071 = vmatprep.subr.bf16.mxu1 %v1990_v43 }
 0x3e6   :  { %v820_v7 = vpop.f32.mrf.mxu0  ;;  %v861_v15 = vpop.f32.mrf.mxu1 }
 0x3e7   :  { %v868_v2 = vadd.f32 %v820_v7, %v781_v0  ;;  %v870_v36 = vadd.f32 %v861_v15, %v783_v27 }
 0x3e8   :  { %v822_v1 = vpop.f32.mrf.mxu0  ;;  %v863_v18 = vpop.f32.mrf.mxu1 }
 0x3e9   :  { %v1583_v20 = vmul.f32 -1.442695, %v868_v2  ;;  %v869_v29 = vadd.f32 %v822_v1, %v782_v3  ;;  %v871_v30 = vadd.f32 %v863_v18, %v784_v26 }
 0x3ea   :  { %v824_v23 = vpop.f32.mrf.mxu0  ;;  %v865_v6 = vpop.f32.mrf.mxu1 }
 0x3eb   :  { %1706 = vpow2.f32 %v1583_v20  ;;  %v1584_v24 = vmul.f32 -1.442695, %v869_v29  ;;  %v1585_v33 = vmul.f32 -1.442695, %v871_v30 }
 0x3ec   :  { %v825_v25 = vpop.f32.mrf.mxu0  ;;  %v866_v28 = vpop.f32.mrf.mxu1 }
 0x3ed   :  { %1708 = vpow2.f32 %v1584_v24 }
 0x3ee   :  { %1710 = vpow2.f32 %v1585_v33 }
 0x3f8   :  { %v1707_v35 = vpop.eup %1706 }
 0x3f9   :  { %v875_v16 = vadd.f32 1.0, %v1707_v35 }
 0x3fa   :  { %v1709_v37 = vpop.eup %1708 }
 0x3fb   :  { %1712 = vrcp.f32 %v875_v16  ;;  %v881_v38 = vadd.f32 1.0, %v1709_v37  ;;  %v1711_v0 = vpop.eup %1710 }
 0x3fc   :  { %1714 = vtanh.f32 %v870_v36  ;;  %v888_v1 = vadd.f32 1.0, %v1711_v0  ;;  %v1587_v36 = vld [vmem:[%s2485_s0 + $0x48] sm:$0xff] }
 0x3fd   :  { %1716 = vrcp.f32 %v881_v38  ;;  %v902_v37 = vunpack.c.h.bf16 %v1587_v36 }
 0x3fe   :  { %1718 = vrcp.f32 %v888_v1 }
 0x3ff   :  { %v906_v1 = vadd.f32 %v902_v37, %v2173_v34 }
 0x408   :  { %v1713_v3 = vpop.eup %1712 }
 0x409   :  { %v1715_v7 = vpop.eup %1714 }
 0x40a   :  { %v1717_v2 = vpop.eup %1716  ;;  %v892_v20 = vmul.f32 %v1715_v7, %v1713_v3 }
 0x40b   :  { %v891_v18 = vmul.f32 %v1717_v2, %v2275_v32  ;;  %v1719_v15 = vpop.eup %1718  ;;  %v1586_v32 = vld [vmem:[%s2485_s0 + $0x40] sm:$0xff] }
 0x40c   :  { %v899_v6 = vunpack.c.l.bf16 %v1586_v32  ;;  %v900_v24 = vunpack.c.h.bf16 %v1586_v32 }
 0x40d   :  { %v2323_v21 = vadd.f32 %v892_v20, %v891_v18  ;;  %v901_v20 = vunpack.c.l.bf16 %v1587_v36 }
 0x40e   :  { %v903_v25 = vadd.f32 %v899_v6, %v2164_v17  ;;  %v904_v28 = vadd.f32 %v900_v24, %v2166_v19 }
 0x40f   :  { %1720 = vtanh.f32 %v2323_v21 }
 0x41c   :  { %v1721_v29 = vpop.eup %1720 }
 0x41d   :  { %v895_v22 = vmul.f32 %v1721_v29, %v1719_v15  ;;  %v905_v15 = vadd.f32 %v901_v20, %v2175_v39 }
 0x41f   :  { %v907_v23 = vpack.c.bf16 %v895_v22, %v895_v22 }
 0x421   :  { %941 = vmatmul.mubr.bf16.vlgmr.msra.gmra.mxu0 %v907_v23  ;;  %982 = vmatmul.mubr.bf16.vlgmr.msra.gmra.mxu1 %v907_v23 }
 0x422   :  { %1031 = vmatpush1.bf16.msra.mxu0 %v1986_v41  ;;  %1072 = vmatpush1.bf16.msra.mxu1 %v1993_v44 }
 0x423   :  { %1032 = vmatprep.subr.bf16.mxu0 %v1988_v42  ;;  %1073 = vmatprep.subr.bf16.mxu1 %v1995_v45 }
 0x424   :  { %1062 = vmatprep.mubr.bf16.mxu0 %v1790_v50  ;;  %1103 = vmatprep.mubr.bf16.mxu1 %v1790_v50 }
 0x426   :  { %1033 = vmatpush1.bf16.msra.mxu0 %v1998_v46  ;;  %1074 = vmatpush1.bf16.msra.mxu1 %v2005_v48 }
 0x427   :  { %1034 = vmatprep.subr.bf16.mxu0 %v2002_v47  ;;  %1075 = vmatprep.subr.bf16.mxu1 %v2008_v49 }
 0x42a   :  { %1035 = vmatpush1.bf16.msra.mxu0 %v2012_v51  ;;  %1076 = vmatpush1.bf16.msra.mxu1 %v2020_v53 }
 0x42b   :  { %1036 = vmatprep.subr.bf16.mxu0 %v2017_v52  ;;  %1077 = vmatprep.subr.bf16.mxu1 %v2025_v54 }
 0x42e   :  { %1037 = vmatpush1.bf16.msra.mxu0 %v2031_v55  ;;  %1078 = vmatpush1.bf16.msra.mxu1 %v2041_v57 }
 0x42f   :  { %1038 = vmatprep.subr.bf16.mxu0 %v2036_v56  ;;  %1079 = vmatprep.subr.bf16.mxu1 %v2046_v58 }
 0x432   :  { %1039 = vmatpush1.bf16.msra.mxu0 %v2051_v59  ;;  %1080 = vmatpush1.bf16.msra.mxu1 %v2061_v61 }
 0x433   :  { %1040 = vmatprep.subr.bf16.mxu0 %v2056_v60  ;;  %1081 = vmatprep.subr.bf16.mxu1 %v2066_v62 }
 0x436   :  { %1041 = vmatpush1.bf16.msra.mxu0 %v2071_v63  ;;  %1082 = vmatpush1.bf16.msra.mxu1 %v2081_v13 }
 0x437   :  { %1042 = vmatprep.subr.bf16.mxu0 %v2076_v12  ;;  %1083 = vmatprep.subr.bf16.mxu1 %v2086_v14 }
 0x43a   :  { %1043 = vmatpush1.bf16.msra.mxu0 %v2091_v8  ;;  %1084 = vmatpush1.bf16.msra.mxu1 %v2101_v9 }
 0x43b   :  { %1044 = vmatprep.subr.bf16.mxu0 %v2096_v10  ;;  %1085 = vmatprep.subr.bf16.mxu1 %v2106_v11 }
 0x43e   :  { %1045 = vmatpush1.bf16.msra.mxu0 %v2111_v4  ;;  %1086 = vmatpush1.bf16.msra.mxu1 %v2117_v5 }
 0x43f   :  { %1152 = vmatprep.subr.bf16.mxu0 %v1984_v40  ;;  %1193 = vmatprep.subr.bf16.mxu1 %v1990_v43 }
 0x4e1   :  { %v942_v26 = vpop.f32.mrf.mxu0  ;;  %v983_v31 = vpop.f32.mrf.mxu1 }
 0x4e2   :  { %v990_v30 = vadd.f32 %v942_v26, %v903_v25  ;;  %v992_v23 = vadd.f32 %v983_v31, %v905_v15 }
 0x4e3   :  { %v944_v27 = vpop.f32.mrf.mxu0  ;;  %v985_v33 = vpop.f32.mrf.mxu1 }
 0x4e4   :  { %v1588_v35 = vmul.f32 -1.442695, %v990_v30  ;;  %v991_v16 = vadd.f32 %v944_v27, %v904_v28  ;;  %v993_v18 = vadd.f32 %v985_v33, %v906_v1 }
 0x4e5   :  { %v946_v38 = vpop.f32.mrf.mxu0  ;;  %v987_v0 = vpop.f32.mrf.mxu1 }
 0x4e6   :  { %1722 = vpow2.f32 %v1588_v35  ;;  %v1589_v3 = vmul.f32 -1.442695, %v991_v16  ;;  %v1590_v29 = vmul.f32 -1.442695, %v993_v18 }
 0x4e7   :  { %v947_v7 = vpop.f32.mrf.mxu0  ;;  %v988_v2 = vpop.f32.mrf.mxu1 }
 0x4e8   :  { %1724 = vpow2.f32 %v1589_v3 }
 0x4e9   :  { %1726 = vpow2.f32 %v1590_v29 }
 0x4f3   :  { %v1723_v22 = vpop.eup %1722 }
 0x4f4   :  { %v997_v32 = vadd.f32 1.0, %v1723_v22 }
 0x4f5   :  { %v1725_v6 = vpop.eup %1724 }
 0x4f6   :  { %1728 = vrcp.f32 %v997_v32  ;;  %v1003_v24 = vadd.f32 1.0, %v1725_v6  ;;  %v1727_v25 = vpop.eup %1726 }
 0x4f7   :  { %1730 = vtanh.f32 %v992_v23  ;;  %v1010_v27 = vadd.f32 1.0, %v1727_v25 }
 0x4f8   :  { %1732 = vrcp.f32 %v1003_v24 }
 0x4f9   :  { %1734 = vrcp.f32 %v1010_v27 }
 0x503   :  { %v1729_v28 = vpop.eup %1728 }
 0x504   :  { %v1731_v26 = vpop.eup %1730 }
 0x505   :  { %v1733_v30 = vpop.eup %1732  ;;  %v1014_v35 = vmul.f32 %v1731_v26, %v1729_v28 }
 0x506   :  { %v1013_v33 = vmul.f32 %v1733_v30, %v2323_v21  ;;  %v1735_v31 = vpop.eup %1734  ;;  %v1591_v21 = vld [vmem:[%s2485_s0 + $0x50] sm:$0xff] }
 0x507   :  { %v1021_v0 = vunpack.c.l.bf16 %v1591_v21  ;;  %v1022_v3 = vunpack.c.h.bf16 %v1591_v21 }
 0x508   :  { %v2371_v36 = vadd.f32 %v1014_v35, %v1013_v33 }
 0x509   :  { %v1025_v7 = vadd.f32 %v1021_v0, %v2164_v17  ;;  %v1026_v2 = vadd.f32 %v1022_v3, %v2166_v19 }
 0x50a   :  { %1736 = vtanh.f32 %v2371_v36 }
 0x517   :  { %v1737_v16 = vpop.eup %1736 }
 0x518   :  { %v1017_v37 = vmul.f32 %v1737_v16, %v1735_v31 }
 0x51a   :  { %v1029_v38 = vpack.c.bf16 %v1017_v37, %v1017_v37 }
 0x51c   :  { %1063 = vmatmul.mubr.bf16.vlgmr.msra.gmra.mxu0 %v1029_v38  ;;  %1104 = vmatmul.mubr.bf16.vlgmr.msra.gmra.mxu1 %v1029_v38 }
 0x51d   :  { %1153 = vmatpush1.bf16.msra.mxu0 %v1986_v41  ;;  %1194 = vmatpush1.bf16.msra.mxu1 %v1993_v44 }
 0x51e   :  { %1154 = vmatprep.subr.bf16.mxu0 %v1988_v42  ;;  %1195 = vmatprep.subr.bf16.mxu1 %v1995_v45 }
 0x51f   :  { %1184 = vmatprep.mubr.bf16.mxu0 %v1790_v50  ;;  %1225 = vmatprep.mubr.bf16.mxu1 %v1790_v50 }
 0x521   :  { %1155 = vmatpush1.bf16.msra.mxu0 %v1998_v46  ;;  %1196 = vmatpush1.bf16.msra.mxu1 %v2005_v48 }
 0x522   :  { %1156 = vmatprep.subr.bf16.mxu0 %v2002_v47  ;;  %1197 = vmatprep.subr.bf16.mxu1 %v2008_v49 }
 0x525   :  { %1157 = vmatpush1.bf16.msra.mxu0 %v2012_v51  ;;  %1198 = vmatpush1.bf16.msra.mxu1 %v2020_v53 }
 0x526   :  { %1158 = vmatprep.subr.bf16.mxu0 %v2017_v52  ;;  %1199 = vmatprep.subr.bf16.mxu1 %v2025_v54 }
 0x529   :  { %1159 = vmatpush1.bf16.msra.mxu0 %v2031_v55  ;;  %1200 = vmatpush1.bf16.msra.mxu1 %v2041_v57 }
 0x52a   :  { %1160 = vmatprep.subr.bf16.mxu0 %v2036_v56  ;;  %1201 = vmatprep.subr.bf16.mxu1 %v2046_v58 }
 0x52d   :  { %1161 = vmatpush1.bf16.msra.mxu0 %v2051_v59  ;;  %1202 = vmatpush1.bf16.msra.mxu1 %v2061_v61 }
 0x52e   :  { %1162 = vmatprep.subr.bf16.mxu0 %v2056_v60  ;;  %1203 = vmatprep.subr.bf16.mxu1 %v2066_v62 }
 0x531   :  { %1163 = vmatpush1.bf16.msra.mxu0 %v2071_v63  ;;  %1204 = vmatpush1.bf16.msra.mxu1 %v2081_v13 }
 0x532   :  { %1164 = vmatprep.subr.bf16.mxu0 %v2076_v12  ;;  %1205 = vmatprep.subr.bf16.mxu1 %v2086_v14 }
 0x535   :  { %1165 = vmatpush1.bf16.msra.mxu0 %v2091_v8  ;;  %1206 = vmatpush1.bf16.msra.mxu1 %v2101_v9 }
 0x536   :  { %1166 = vmatprep.subr.bf16.mxu0 %v2096_v10  ;;  %1207 = vmatprep.subr.bf16.mxu1 %v2106_v11 }
 0x539   :  { %1167 = vmatpush1.bf16.msra.mxu0 %v2111_v4  ;;  %1208 = vmatpush1.bf16.msra.mxu1 %v2117_v5 }
 0x53a   :  { %1274 = vmatprep.subr.bf16.mxu0 %v1984_v40  ;;  %1315 = vmatprep.subr.bf16.mxu1 %v1990_v43  ;;  %v1592_v40 = vld [vmem:[%s2485_s0 + $0x58] sm:$0xff] }
 0x53b   :  { %v1024_v23 = vunpack.c.h.bf16 %v1592_v40  ;;  %v1023_v30 = vunpack.c.l.bf16 %v1592_v40 }
 0x53d   :  { %v1028_v26 = vadd.f32 %v1024_v23, %v2173_v34  ;;  %v1027_v35 = vadd.f32 %v1023_v30, %v2175_v39 }
 0x5dc   :  { %v1064_v1 = vpop.f32.mrf.mxu0  ;;  %v1105_v20 = vpop.f32.mrf.mxu1 }
 0x5dd   :  { %v1112_v18 = vadd.f32 %v1064_v1, %v1025_v7  ;;  %v1114_v16 = vadd.f32 %v1105_v20, %v1027_v35  ;;  %v1650_v35 = vld [vmem:[#allocation5 + $0x38] sm:$0xff]  }
 0x5de   :  { %v1066_v15 = vpop.f32.mrf.mxu0  ;;  %v1107_v29 = vpop.f32.mrf.mxu1 }
 0x5df   :  { %v1593_v22 = vmul.f32 -1.442695, %v1112_v18  ;;  %v1113_v43 = vadd.f32 %v1066_v15, %v1026_v2  ;;  %v1115_v27 = vadd.f32 %v1107_v29, %v1028_v26 }
 0x5e0   :  { %v1068_v32 = vpop.f32.mrf.mxu0  ;;  %v1109_v6 = vpop.f32.mrf.mxu1 }
 0x5e1   :  { %1738 = vpow2.f32 %v1593_v22  ;;  %v1594_v24 = vmul.f32 -1.442695, %v1113_v43  ;;  %v1595_v33 = vmul.f32 -1.442695, %v1115_v27 }
 0x5e2   :  { %v1069_v25 = vpop.f32.mrf.mxu0  ;;  %v1110_v28 = vpop.f32.mrf.mxu1 }
 0x5e3   :  { %1740 = vpow2.f32 %v1594_v24 }
 0x5e4   :  { %1742 = vpow2.f32 %v1595_v33  ;;  %v1792_v33 = vmov 0.0  }
 0x5ee   :  { %v1739_v31 = vpop.eup %1738 }
 0x5ef   :  { %v1119_v37 = vadd.f32 1.0, %v1739_v31  ;;  %v1651_v31 = vld [vmem:[#allocation5 + $0x30] sm:$0xff]  }
 0x5f0   :  { %v1741_v38 = vpop.eup %1740 }
 0x5f1   :  { %1744 = vrcp.f32 %v1119_v37  ;;  %v1125_v21 = vadd.f32 1.0, %v1741_v38  ;;  %v1743_v0 = vpop.eup %1742  ;;  %v1653_v37 = vld [vmem:[#allocation5 + $0x20] sm:$0xff]   ;;  %v1654_v38 = vld [vmem:[#allocation5 + $0x18] sm:$0xff]  }
 0x5f2   :  { %1746 = vtanh.f32 %v1114_v16  ;;  %v1132_v1 = vadd.f32 1.0, %v1743_v0  ;;  %v1652_v16 = vld [vmem:[#allocation5 + $0x28] sm:$0xff]  }
 0x5f3   :  { %1748 = vrcp.f32 %v1125_v21  ;;  %v1655_v21 = vld [vmem:[#allocation5 + $0x10] sm:$0xff]   ;;  %v1656_v0 = vld [vmem:[#allocation5 + $0x8] sm:$0xff]  }
 0x5f4   :  { %1750 = vrcp.f32 %v1132_v1 }
 0x5fe   :  { %v1745_v3 = vpop.eup %1744 }
 0x5ff   :  { %v1747_v7 = vpop.eup %1746 }
 0x600   :  { %v1749_v2 = vpop.eup %1748  ;;  %v1136_v18 = vmul.f32 %v1747_v7, %v1745_v3  ;;  %v1657_v3 = vld [vmem:[#allocation5] sm:$0xff]   ;;  %v1601_v7 = vld [vmem:[%s2485_s0 + $0x70] sm:$0xff] }
 0x601   :  { %v1135_v15 = vmul.f32 %v1749_v2, %v2371_v36  ;;  %v1751_v20 = vpop.eup %1750  ;;  %v1265_v2 = vunpack.c.l.bf16 %v1601_v7  ;;  %v1266_v1 = vunpack.c.h.bf16 %v1601_v7 }
 0x603   :  { %v2419_v29 = vadd.f32 %v1136_v18, %v1135_v15  ;;  %v1269_v18 = vadd.f32 %v1265_v2, %v2164_v17  ;;  %v1270_v15 = vadd.f32 %v1266_v1, %v2166_v19 }
 0x605   :  { %1752 = vtanh.f32 %v2419_v29 }
 0x612   :  { %v1753_v22 = vpop.eup %1752 }
 0x613   :  { %v1139_v40 = vmul.f32 %v1753_v22, %v1751_v20 }
 0x615   :  { %v1151_v43 = vpack.c.bf16 %v1139_v40, %v1139_v40 }
 0x617   :  { %1185 = vmatmul.mubr.bf16.vlgmr.msra.gmra.mxu0 %v1151_v43  ;;  %1226 = vmatmul.mubr.bf16.vlgmr.msra.gmra.mxu1 %v1151_v43 }
 0x618   :  { %1275 = vmatpush1.bf16.msra.mxu0 %v1986_v41  ;;  %1316 = vmatpush1.bf16.msra.mxu1 %v1993_v44  ;;  %v1596_v41 = vld [vmem:[%s2485_s0 + $0x60] sm:$0xff] }
 0x619   :  { %1276 = vmatprep.subr.bf16.mxu0 %v1988_v42  ;;  %1317 = vmatprep.subr.bf16.mxu1 %v1995_v45  ;;  %v1143_v42 = vunpack.c.l.bf16 %v1596_v41  ;;  %v1144_v44 = vunpack.c.h.bf16 %v1596_v41 }
 0x61a   :  { %1306 = vmatprep.mubr.bf16.mxu0 %v1790_v50  ;;  %1347 = vmatprep.mubr.bf16.mxu1 %v1790_v50 }
 0x61b   :  { %v1147_v45 = vadd.f32 %v1143_v42, %v2164_v17  ;;  %v1602_v42 = vld [vmem:[%s2485_s0 + $0x78] sm:$0xff] }
 0x61c   :  { %1277 = vmatpush1.bf16.msra.mxu0 %v1998_v46  ;;  %1318 = vmatpush1.bf16.msra.mxu1 %v2005_v48  ;;  %v1148_v46 = vadd.f32 %v1144_v44, %v2166_v19 }
 0x61d   :  { %1278 = vmatprep.subr.bf16.mxu0 %v2002_v47  ;;  %1319 = vmatprep.subr.bf16.mxu1 %v2008_v49 }
 0x620   :  { %1279 = vmatpush1.bf16.msra.mxu0 %v2012_v51  ;;  %1320 = vmatpush1.bf16.msra.mxu1 %v2020_v53  ;;  %v1597_v53 = vld [vmem:[%s2485_s0 + $0x68] sm:$0xff] }
 0x621   :  { %1280 = vmatprep.subr.bf16.mxu0 %v2017_v52  ;;  %1321 = vmatprep.subr.bf16.mxu1 %v2025_v54 }
 0x624   :  { %1281 = vmatpush1.bf16.msra.mxu0 %v2031_v55  ;;  %1322 = vmatpush1.bf16.msra.mxu1 %v2041_v57  ;;  %v1146_v55 = vunpack.c.h.bf16 %v1597_v53 }
 0x625   :  { %1282 = vmatprep.subr.bf16.mxu0 %v2036_v56  ;;  %1323 = vmatprep.subr.bf16.mxu1 %v2046_v58 }
 0x628   :  { %1283 = vmatpush1.bf16.msra.mxu0 %v2051_v59  ;;  %1324 = vmatpush1.bf16.msra.mxu1 %v2061_v61  ;;  %v1150_v61 = vadd.f32 %v1146_v55, %v2173_v34 }
 0x629   :  { %1284 = vmatprep.subr.bf16.mxu0 %v2056_v60  ;;  %1325 = vmatprep.subr.bf16.mxu1 %v2066_v62  ;;  %v1145_v62 = vunpack.c.l.bf16 %v1597_v53 }
 0x62c   :  { %1285 = vmatpush1.bf16.msra.mxu0 %v2071_v63  ;;  %1326 = vmatpush1.bf16.msra.mxu1 %v2081_v13 }
 0x62d   :  { %1286 = vmatprep.subr.bf16.mxu0 %v2076_v12  ;;  %1327 = vmatprep.subr.bf16.mxu1 %v2086_v14  ;;  %v1149_v12 = vadd.f32 %v1145_v62, %v2175_v39 }
 0x630   :  { %1287 = vmatpush1.bf16.msra.mxu0 %v2091_v8  ;;  %1328 = vmatpush1.bf16.msra.mxu1 %v2101_v9 }
 0x631   :  { %1288 = vmatprep.subr.bf16.mxu0 %v2096_v10  ;;  %1329 = vmatprep.subr.bf16.mxu1 %v2106_v11 }
 0x634   :  { %1289 = vmatpush1.bf16.msra.mxu0 %v2111_v4  ;;  %1330 = vmatpush1.bf16.msra.mxu1 %v2117_v5 }
 0x635   :  { %1626 = vmatprep.subr.bf16.mxu0 %v1792_v33 }
 0x6d7   :  { %v1186_v47 = vpop.f32.mrf.mxu0  ;;  %v1227_v48 = vpop.f32.mrf.mxu1 }
 0x6d8   :  { %v1234_v49 = vadd.f32 %v1186_v47, %v1147_v45  ;;  %v1236_v8 = vadd.f32 %v1227_v48, %v1149_v12  ;;  %v1268_v45 = vunpack.c.h.bf16 %v1602_v42 }
 0x6d9   :  { %v1188_v50 = vpop.f32.mrf.mxu0  ;;  %v1229_v51 = vpop.f32.mrf.mxu1 }
 0x6da   :  { %v1598_v52 = vmul.f32 -1.442695, %v1234_v49  ;;  %v1235_v54 = vadd.f32 %v1188_v50, %v1148_v46  ;;  %v1237_v63 = vadd.f32 %v1229_v51, %v1150_v61  ;;  %v1272_v19 = vadd.f32 %v1268_v45, %v2173_v34 }
 0x6db   :  { %v1190_v56 = vpop.f32.mrf.mxu0  ;;  %v1231_v57 = vpop.f32.mrf.mxu1  ;;  %v1267_v50 = vunpack.c.l.bf16 %v1602_v42 }
 0x6dc   :  { %1754 = vpow2.f32 %v1598_v52  ;;  %v1599_v58 = vmul.f32 -1.442695, %v1235_v54  ;;  %v1600_v13 = vmul.f32 -1.442695, %v1237_v63 }
 0x6dd   :  { %v1191_v59 = vpop.f32.mrf.mxu0  ;;  %v1232_v60 = vpop.f32.mrf.mxu1  ;;  %v1271_v52 = vadd.f32 %v1267_v50, %v2175_v39 }
 0x6de   :  { %1756 = vpow2.f32 %v1599_v58 }
 0x6df   :  { %1758 = vpow2.f32 %v1600_v13 }
 0x6e9   :  { %v1755_v14 = vpop.eup %1754 }
 0x6ea   :  { %v1241_v10 = vadd.f32 1.0, %v1755_v14 }
 0x6eb   :  { %v1757_v9 = vpop.eup %1756 }
 0x6ec   :  { %1760 = vrcp.f32 %v1241_v10  ;;  %v1247_v11 = vadd.f32 1.0, %v1757_v9  ;;  %v1759_v4 = vpop.eup %1758  ;;  %v1606_v9 = vld [vmem:[%s2487_s2] ss:$0 sm:$0xff] }
 0x6ed   :  { %1762 = vtanh.f32 %v1236_v8  ;;  %v1254_v32 = vadd.f32 1.0, %v1759_v4 }
 0x6ee   :  { %1764 = vrcp.f32 %v1247_v11 }
 0x6ef   :  { %1766 = vrcp.f32 %v1254_v32 }
 0x6f9   :  { %v1761_v5 = vpop.eup %1760 }
 0x6fa   :  { %v1763_v36 = vpop.eup %1762 }
 0x6fb   :  { %v1765_v23 = vpop.eup %1764  ;;  %v1258_v6 = vmul.f32 %v1763_v36, %v1761_v5 }
 0x6fc   :  { %v1257_v24 = vmul.f32 %v1765_v23, %v2419_v29  ;;  %v1767_v28 = vpop.eup %1766 }
 0x6fe   :  { %v2465_v25 = vadd.f32 %v1258_v6, %v1257_v24 }
 0x700   :  { %1768 = vtanh.f32 %v2465_v25 }
 0x70d   :  { %v1769_v26 = vpop.eup %1768 }
 0x70e   :  { %v1261_v30 = vmul.f32 %v1769_v26, %v1767_v28 }
 0x710   :  { %v1273_v27 = vpack.c.bf16 %v1261_v30, %v1261_v30 }
 0x712   :  { %1307 = vmatmul.mubr.bf16.vlgmr.msra.gmra.mxu0 %v1273_v27  ;;  %1348 = vmatmul.mubr.bf16.vlgmr.msra.gmra.mxu1 %v1273_v27 }
 0x713   :  { %1627 = vmatpush3.bf16.msra.mxu0 %v1650_v35  ;;  %1642 = vmatprep.mubr.msk.bf16.mxu0 %vm1793_vm0, %v1792_v33 }
 0x714   :  { %1628 = vmatprep.subr.bf16.mxu0 %v1792_v33 }
 0x717   :  { %1629 = vmatpush3.bf16.msra.mxu0 %v1651_v31 }
 0x718   :  { %1630 = vmatprep.subr.bf16.mxu0 %v1792_v33 }
 0x71b   :  { %1631 = vmatpush3.bf16.msra.mxu0 %v1652_v16 }
 0x71c   :  { %1632 = vmatprep.subr.bf16.mxu0 %v1792_v33 }
 0x71f   :  { %1633 = vmatpush3.bf16.msra.mxu0 %v1653_v37 }
 0x720   :  { %1634 = vmatprep.subr.bf16.mxu0 %v1792_v33 }
 0x723   :  { %1635 = vmatpush3.bf16.msra.mxu0 %v1654_v38 }
 0x724   :  { %1636 = vmatprep.subr.bf16.mxu0 %v1792_v33 }
 0x727   :  { %1637 = vmatpush3.bf16.msra.mxu0 %v1655_v21 }
 0x728   :  { %1638 = vmatprep.subr.bf16.mxu0 %v1792_v33 }
 0x72b   :  { %1639 = vmatpush3.bf16.msra.mxu0 %v1656_v0 }
 0x72c   :  { %1640 = vmatprep.subr.bf16.mxu0 %v1792_v33 }
 0x72f   :  { %1641 = vmatpush3.bf16.msra.mxu0 %v1657_v3 }
 0x7d2   :  { %v1308_v29 = vpop.f32.mrf.mxu0  ;;  %v1349_v20 = vpop.f32.mrf.mxu1 }
 0x7d3   :  { %v1356_v22 = vadd.f32 %v1308_v29, %v1269_v18  ;;  %v1358_v55 = vadd.f32 %v1349_v20, %v1271_v52 }
 0x7d4   :  { %v1310_v40 = vpop.f32.mrf.mxu0  ;;  %v1351_v43 = vpop.f32.mrf.mxu1 }
 0x7d5   :  { %v1603_v41 = vmul.f32 -1.442695, %v1356_v22  ;;  %v1357_v44 = vadd.f32 %v1310_v40, %v1270_v15  ;;  %v1359_v51 = vadd.f32 %v1351_v43, %v1272_v19 }
 0x7d6   :  { %v1312_v46 = vpop.f32.mrf.mxu0  ;;  %v1353_v47 = vpop.f32.mrf.mxu1 }
 0x7d7   :  { %1770 = vpow2.f32 %v1603_v41  ;;  %v1604_v48 = vmul.f32 -1.442695, %v1357_v44  ;;  %v1605_v53 = vmul.f32 -1.442695, %v1359_v51 }
 0x7d8   :  { %v1313_v49 = vpop.f32.mrf.mxu0  ;;  %v1354_v17 = vpop.f32.mrf.mxu1 }
 0x7d9   :  { %1772 = vpow2.f32 %v1604_v48 }
 0x7da   :  { %1774 = vpow2.f32 %v1605_v53 }
 0x7e4   :  { %v1771_v54 = vpop.eup %1770 }
 0x7e5   :  { %v1363_v56 = vadd.f32 1.0, %v1771_v54 }
 0x7e6   :  { %v1773_v57 = vpop.eup %1772 }
 0x7e7   :  { %1776 = vrcp.f32 %v1363_v56  ;;  %v1369_v58 = vadd.f32 1.0, %v1773_v57  ;;  %v1775_v59 = vpop.eup %1774 }
 0x7e8   :  { %1778 = vtanh.f32 %v1358_v55  ;;  %v1376_v63 = vadd.f32 1.0, %v1775_v59 }
 0x7e9   :  { %1780 = vrcp.f32 %v1369_v58 }
 0x7ea   :  { %1782 = vrcp.f32 %v1376_v63 }
 0x7f4   :  { %v1777_v60 = vpop.eup %1776 }
 0x7f5   :  { %v1779_v61 = vpop.eup %1778 }
 0x7f6   :  { %v1781_v62 = vpop.eup %1780  ;;  %v1380_v34 = vmul.f32 %v1779_v61, %v1777_v60 }
 0x7f7   :  { %v1379_v12 = vmul.f32 %v1781_v62, %v2465_v25  ;;  %v1783_v39 = vpop.eup %1782 }
 0x7f9   :  { %v1381_v13 = vadd.f32 %v1380_v34, %v1379_v12 }
 0x7fb   :  { %1784 = vtanh.f32 %v1381_v13 }
 0x808   :  { %v1785_v14 = vpop.eup %1784 }
 0x809   :  { %v1383_v8 = vmul.f32 %v1785_v14, %v1783_v39 }
 0x80b   :  { %v1390_v10 = vpack.c.bf16 %v1383_v8, %v1383_v8 }
 0x80d   :  { %1643 = vmatmul.mubr.bf16.vlgmr.msra.gmra.mxu0 %v1390_v10 }
 0x8cd   :  { %v1496_v11 = vpop.f32.mrf.mxu0 }
 0x8ce   :  { %v1497_v4 = vadd.f32 %v1606_v9, %v1496_v11 }
 0x8cf   :  { %v1644_v5 = vpop.f32.mrf.mxu0 }
 0x8d0   :  { %1502 = vst [vmem:[%s2490_s5] sm:$0xff] %v1497_v4 }
 0x8d1   :  { %v1499_v36 = vpop.f32.mrf.mxu0 }
 0x8d3   :  { %v1645_v23 = vpop.f32.mrf.mxu0 }
 0x8d4   :  { %1507 = vsyncmov [#allocation6] }
 0x8d7   :  { %s1508_s29 = vpop.sfrf %1507 }
 0x8d8   :  { %p1615_p0 = scmp.ne.s32.totalorder %s1508_s29, 0 }
 0x8da   :  { %1512 = shalt.err (%p1615_p0)  }
 0x8db   :  { %1514 = vsyncmov [#allocation6 + $0x1] }
 0x8de   :  { %s1515_s30 = vpop.sfrf %1514 }
 0x8df   :  { %p1616_p1 = scmp.ne.s32.totalorder %s1515_s30, 0 }
 0x8e1   :  { %1519 = shalt.err (%p1616_p1)  }

</bundles_post_ra>
